<compile_context>
chip_gen: v7x
topology: tpu7x:2x2x1
jax: 0.10.0
libtpu: 0.0.40
codegen_flags: <defaults>
</compile_context>

<pallas_src>
import functools

import jax
import jax.numpy as jnp
from jax import lax
from jax.experimental import pallas as pl
from jax.experimental.pallas import tpu as pltpu


def _round_up(x, m):
    return (x + m - 1) // m * m


def _upconv_bn_relu_kernel(xm_ref, xh_ref, w_ref, bias_ref, o_ref):
    """One grid step = one (batch, output-row-tile).

    xm_ref:   (1, th//2, Wout+2, Cin_p)  main input rows (original H resolution,
                                         W already 2x-upsampled + 1px zero pad,
                                         channels padded, bf16)
    xh_ref:   (1, 2,     Wout+2, Cin_p)  2-row halo directly below the main rows
    w_ref:    (3, 3*Cin_p, Cout_p)       BN-scale-folded conv weight, bf16
    bias_ref: (1, Cout_p)                folded BN/conv bias, f32
    o_ref:    (1, th, Wout, Cout_p)      output tile, f32
    """
    _, hh, wp, cin_p = xm_ref.shape
    _, th, w_out, cout_p = o_ref.shape

    # Stitch main rows + halo rows: rows [i*hh, i*hh + hh + 2) of the prepped input.
    xt = jnp.concatenate([xm_ref[0], xh_ref[0]], axis=0)          # (hh+2, wp, cin_p)

    # Nearest 2x upsample along H, in VMEM (row r of xu = xt[r // 2]).
    xu = jnp.broadcast_to(xt[:, None, :, :], (hh + 2, 2, wp, cin_p))
    xu = xu.reshape(2 * hh + 4, wp, cin_p)
    # pad(up(x), 1) == up(pad(x, 1))[1:-1]  -> drop one row top & bottom.
    xwin = xu[1:th + 3, :, :]                                     # (th+2, wp, cin_p)

    # 3x3 conv as 3 MXU matmuls with K = 3*Cin_p (dx folded into contraction).
    acc = jnp.zeros((th * w_out, cout_p), dtype=jnp.float32)
    for dy in range(3):
        slab = xwin[dy:dy + th, :, :]                             # (th, wp, cin_p)
        patch = jnp.concatenate(
            [slab[:, 0:w_out, :],
             slab[:, 1:w_out + 1, :],
             slab[:, 2:w_out + 2, :]],
            axis=-1)                                              # (th, w_out, 3*cin_p)
        acc = acc + jnp.dot(
            patch.reshape(th * w_out, 3 * cin_p), w_ref[dy],
            preferred_element_type=jnp.float32)

    y = jnp.maximum(acc + bias_ref[0, :], 0.0)                    # bias + ReLU
    o_ref[0] = y.reshape(th, w_out, cout_p).astype(o_ref.dtype)


def _pick_row_tile(h_out, w_out, cin_p, cout_p, vmem_budget_bytes=8 * 1024 * 1024):
    """Largest output-row tile (multiple of 4, divides h_out) fitting the budget.

    Budget is sized conservatively for v7x (64 MiB physical / 32 MiB scoped VMEM);
    it can be raised on v5e/v6e (128 MiB VMEM).
    """
    def tile_bytes(th):
        hh = th // 2
        inp = 2 * (hh + 2) * (w_out + 2) * cin_p * 2      # bf16, double-buffered
        out = 2 * th * w_out * cout_p * 4                 # f32, double-buffered
        acc = th * w_out * cout_p * 4
        im2col = th * w_out * 3 * cin_p * 2
        return inp + out + acc + im2col

    best, th = 4, 4
    while th <= h_out:
        if h_out % th == 0 and tile_bytes(th) <= vmem_budget_bytes:
            best = th
        th *= 2
    return best


def up_conv_forward(x_nchw, params, *, row_tile=None):
    """up_conv forward. Input/output NCHW (PyTorch convention)."""
    w_hwio = params["w"]            # (3, 3, Cin, Cout)
    n, cin, h, w = x_nchw.shape
    kh, kw, _, cout = w_hwio.shape
    assert kh == 3 and kw == 3
    h_out, w_out = 2 * h, 2 * w
    assert h_out % 4 == 0, "H must be even for the row-tiled halo scheme"

    # Lane-dense channel padding (multiples of 128).
    cin_p = _round_up(cin, 128)
    cout_p = _round_up(cout, 128)

    # Fold inference BatchNorm: scale into the conv weights, shift into the bias.
    scale = params["gamma"] * lax.rsqrt(params["var"] + 1e-5)
    bias = scale * (params["b"] - params["mean"]) + params["beta"]      # (Cout,)
    w_f = w_hwio * scale[None, None, None, :]                           # (3,3,Cin,Cout)

    w_p = jnp.zeros((3, 3, cin_p, cout_p), jnp.float32)
    w_p = w_p.at[:, :, :cin, :cout].set(w_f)
    w_mat = w_p.reshape(3, 3 * cin_p, cout_p).astype(jnp.bfloat16)      # per-ky (3*Cin_p, Cout_p)
    bias_p = jnp.zeros((1, cout_p), jnp.float32).at[0, :cout].set(bias)

    # Input prep (single fused XLA region): NCHW->NHWC, nearest 2x along W,
    # 1px zero pad on H and W, channel pad, bf16.  The 2x along H happens
    # inside the kernel, so the 4x-sized upsampled tensor never hits HBM.
    x = jnp.transpose(x_nchw, (0, 2, 3, 1))                 # (n, h, w, cin)
    x = jnp.repeat(x, 2, axis=2)                            # (n, h, 2w, cin)
    x = jnp.pad(x, ((0, 0), (1, 1), (1, 1), (0, cin_p - cin)))
    x = x.astype(jnp.bfloat16)                              # (n, h+2, 2w+2, cin_p)

    if row_tile is None:
        row_tile = _pick_row_tile(h_out, w_out, cin_p, cout_p)
    th = row_tile
    assert th % 4 == 0 and h_out % th == 0
    hh = th // 2                                            # input-resolution rows per tile
    n_row_tiles = h_out // th
    wp = w_out + 2

    out = pl.pallas_call(
        _upconv_bn_relu_kernel,
        out_shape=jax.ShapeDtypeStruct((n, h_out, w_out, cout_p), jnp.float32),
        grid=(n, n_row_tiles),
        in_specs=[
            # main rows [i*hh, i*hh + hh)
            pl.BlockSpec((1, hh, wp, cin_p), lambda b, i: (b, i, 0, 0)),
            # 2-row halo [i*hh + hh, i*hh + hh + 2)  (same array, shifted index_map)
            pl.BlockSpec((1, 2, wp, cin_p),
                         lambda b, i: (b, (i + 1) * (hh // 2), 0, 0)),
            # constant weight / bias blocks
            pl.BlockSpec((3, 3 * cin_p, cout_p), lambda b, i: (0, 0, 0)),
            pl.BlockSpec((1, cout_p), lambda b, i: (0, 0)),
        ],
        out_specs=pl.BlockSpec((1, th, w_out, cout_p), lambda b, i: (b, i, 0, 0)),
        compiler_params=pltpu.CompilerParams(
            dimension_semantics=("parallel", "parallel"),
            vmem_limit_bytes=32 * 1024 * 1024,
        ),
    )(x, x, w_mat, bias_p)

    out = out[..., :cout]                                   # drop channel padding
    return jnp.transpose(out, (0, 3, 1, 2))                 # NHWC -> NCHW


def init_up_conv_params(key, ch_in, ch_out):
    """Deterministic synthetic params (shapes follow Conv2d / BatchNorm2d)."""
    ks = jax.random.split(key, 6)
    p = {}
    p["w"] = jax.random.normal(ks[0], (3, 3, ch_in, ch_out), jnp.float32) * 0.1  # HWIO
    p["b"] = jax.random.normal(ks[1], (ch_out,), jnp.float32) * 0.1
    p["gamma"] = 1.0 + 0.1 * jax.random.normal(ks[2], (ch_out,), jnp.float32)
    p["beta"] = 0.1 * jax.random.normal(ks[3], (ch_out,), jnp.float32)
    p["mean"] = 0.05 * jax.random.normal(ks[4], (ch_out,), jnp.float32)
    p["var"] = jax.random.uniform(ks[5], (ch_out,), jnp.float32, minval=0.5, maxval=1.5)
    return p


def _reference_forward(x_nchw, params):
    """Pure-JAX f32 reference (nearest upsample + lax conv + BN + ReLU)."""
    x = jnp.transpose(x_nchw, (0, 2, 3, 1))
    x = jnp.repeat(jnp.repeat(x, 2, axis=1), 2, axis=2)
    y = lax.conv_general_dilated(
        x, params["w"], window_strides=(1, 1), padding=((1, 1), (1, 1)),
        dimension_numbers=("NHWC", "HWIO", "NHWC"))
    y = y + params["b"]
    scale = params["gamma"] / jnp.sqrt(params["var"] + 1e-5)
    y = scale * (y - params["mean"]) + params["beta"]
    y = jnp.maximum(y, 0.0)
    return jnp.transpose(y, (0, 3, 1, 2))


if __name__ == "__main__":
    key = jax.random.PRNGKey(0)
    k_x, k_p = jax.random.split(key)

    N, C_IN, C_OUT, H, W = 2, 4, 8, 16, 16
    x = jax.random.normal(k_x, (N, C_IN, H, W), jnp.float32)
    params = init_up_conv_params(k_p, C_IN, C_OUT)

    # row_tile=8 -> 4 row tiles per image: exercises the halo/tiling logic.
    fwd = jax.jit(functools.partial(up_conv_forward, row_tile=8))
    out = jax.block_until_ready(fwd(x, params))

    ref = _reference_forward(x, params)
    assert out.shape == (N, C_OUT, 2 * H, 2 * W)
    err = float(jnp.max(jnp.abs(out - ref)))
    assert err < 5e-2, f"max abs error {err}"  # bf16 matmul tolerance

    print("KERNEL_OK")
</pallas_src>

<mosaic_0001>
module attributes {stable_mosaic.version = 11 : i64} {
  func.func @_upconv_bn_relu_kernel(%arg0: i32, %arg1: i32, %arg2: memref<1x4x34x128xbf16, #tpu.memory_space<vmem>>, %arg3: memref<1x2x34x128xbf16, #tpu.memory_space<vmem>>, %arg4: memref<3x384x128xbf16, #tpu.memory_space<vmem>>, %arg5: memref<1x128xf32, #tpu.memory_space<vmem>>, %arg6: memref<1x8x32x128xf32, #tpu.memory_space<vmem>>) attributes {dimension_semantics = [#tpu.dimension_semantics<parallel>, #tpu.dimension_semantics<parallel>], iteration_bounds = array<i64: 2, 4>, scalar_prefetch = 0 : i64, scratch_operands = 0 : i64, tpu.core_type = #tpu.core_type<tc>, window_params = [{transform_indices = @transform_0, window_bounds = array<i64: 1, 4, 34, 128>}, {transform_indices = @transform_1, window_bounds = array<i64: 1, 2, 34, 128>}, {pipeline_mode = #tpu.pipeline_mode<synchronous>, transform_indices = @transform_2, window_bounds = array<i64: 3, 384, 128>}, {pipeline_mode = #tpu.pipeline_mode<synchronous>, transform_indices = @transform_3, window_bounds = array<i64: 1, 128>}, {transform_indices = @transform_4, window_bounds = array<i64: 1, 8, 32, 128>}]} {
    %c0 = arith.constant 0 : index
    %c0_0 = arith.constant 0 : index
    %c0_1 = arith.constant 0 : index
    %c0_2 = arith.constant 0 : index
    %0 = vector.load %arg2[%c0, %c0_0, %c0_1, %c0_2] : memref<1x4x34x128xbf16, #tpu.memory_space<vmem>>, vector<1x4x34x128xbf16>
    %1 = vector.shape_cast %0 : vector<1x4x34x128xbf16> to vector<4x34x128xbf16>
    %c0_3 = arith.constant 0 : index
    %c0_4 = arith.constant 0 : index
    %c0_5 = arith.constant 0 : index
    %c0_6 = arith.constant 0 : index
    %2 = vector.load %arg3[%c0_3, %c0_4, %c0_5, %c0_6] : memref<1x2x34x128xbf16, #tpu.memory_space<vmem>>, vector<1x2x34x128xbf16>
    %3 = vector.shape_cast %2 : vector<1x2x34x128xbf16> to vector<2x34x128xbf16>
    %4 = tpu.concatenate %1, %3 in 0 : vector<4x34x128xbf16>, vector<2x34x128xbf16> -> vector<6x34x128xbf16>
    %5 = vector.shape_cast %4 : vector<6x34x128xbf16> to vector<6x1x34x128xbf16>
    %6 = vector.shape_cast %5 : vector<6x1x34x128xbf16> to vector<6x1x34x128xbf16>
    %7 = vector.broadcast %6 : vector<6x1x34x128xbf16> to vector<6x2x34x128xbf16>
    %8 = vector.shape_cast %7 : vector<6x2x34x128xbf16> to vector<12x34x128xbf16>
    %9 = vector.extract_strided_slice %8 {offsets = [1, 0, 0], sizes = [10, 34, 128], strides = [1, 1, 1]} : vector<12x34x128xbf16> to vector<10x34x128xbf16>
    %cst = arith.constant 0.000000e+00 : f32
    %10 = vector.broadcast %cst : f32 to vector<256x128xf32>
    %11 = vector.extract_strided_slice %9 {offsets = [0, 0, 0], sizes = [8, 34, 128], strides = [1, 1, 1]} : vector<10x34x128xbf16> to vector<8x34x128xbf16>
    %12 = vector.extract_strided_slice %11 {offsets = [0, 0, 0], sizes = [8, 32, 128], strides = [1, 1, 1]} : vector<8x34x128xbf16> to vector<8x32x128xbf16>
    %13 = vector.extract_strided_slice %11 {offsets = [0, 1, 0], sizes = [8, 32, 128], strides = [1, 1, 1]} : vector<8x34x128xbf16> to vector<8x32x128xbf16>
    %14 = vector.extract_strided_slice %11 {offsets = [0, 2, 0], sizes = [8, 32, 128], strides = [1, 1, 1]} : vector<8x34x128xbf16> to vector<8x32x128xbf16>
    %15 = tpu.concatenate %12, %13, %14 in 2 : vector<8x32x128xbf16>, vector<8x32x128xbf16>, vector<8x32x128xbf16> -> vector<8x32x384xbf16>
    %16 = vector.shape_cast %15 : vector<8x32x384xbf16> to vector<256x384xbf16>
    %c0_7 = arith.constant 0 : index
    %c0_8 = arith.constant 0 : index
    %c0_9 = arith.constant 0 : index
    %17 = vector.load %arg4[%c0_7, %c0_8, %c0_9] : memref<3x384x128xbf16, #tpu.memory_space<vmem>>, vector<1x384x128xbf16>
    %18 = vector.shape_cast %17 : vector<1x384x128xbf16> to vector<384x128xbf16>
    %cst_10 = arith.constant dense<0.000000e+00> : vector<256x128xf32>
    %19 = tpu.matmul %16, %18, %cst_10 {dimension_numbers = #tpu.dot_dimension_numbers<[1], [0], [0], [1], [0, 0, 1, 1], [], []>} : vector<256x384xbf16>, vector<384x128xbf16>, vector<256x128xf32> -> vector<256x128xf32>
    %20 = arith.addf %10, %19 : vector<256x128xf32>
    %21 = vector.extract_strided_slice %9 {offsets = [1, 0, 0], sizes = [8, 34, 128], strides = [1, 1, 1]} : vector<10x34x128xbf16> to vector<8x34x128xbf16>
    %22 = vector.extract_strided_slice %21 {offsets = [0, 0, 0], sizes = [8, 32, 128], strides = [1, 1, 1]} : vector<8x34x128xbf16> to vector<8x32x128xbf16>
    %23 = vector.extract_strided_slice %21 {offsets = [0, 1, 0], sizes = [8, 32, 128], strides = [1, 1, 1]} : vector<8x34x128xbf16> to vector<8x32x128xbf16>
    %24 = vector.extract_strided_slice %21 {offsets = [0, 2, 0], sizes = [8, 32, 128], strides = [1, 1, 1]} : vector<8x34x128xbf16> to vector<8x32x128xbf16>
    %25 = tpu.concatenate %22, %23, %24 in 2 : vector<8x32x128xbf16>, vector<8x32x128xbf16>, vector<8x32x128xbf16> -> vector<8x32x384xbf16>
    %26 = vector.shape_cast %25 : vector<8x32x384xbf16> to vector<256x384xbf16>
    %c1 = arith.constant 1 : index
    %c0_11 = arith.constant 0 : index
    %c0_12 = arith.constant 0 : index
    %27 = vector.load %arg4[%c1, %c0_11, %c0_12] : memref<3x384x128xbf16, #tpu.memory_space<vmem>>, vector<1x384x128xbf16>
    %28 = vector.shape_cast %27 : vector<1x384x128xbf16> to vector<384x128xbf16>
    %cst_13 = arith.constant dense<0.000000e+00> : vector<256x128xf32>
    %29 = tpu.matmul %26, %28, %cst_13 {dimension_numbers = #tpu.dot_dimension_numbers<[1], [0], [0], [1], [0, 0, 1, 1], [], []>} : vector<256x384xbf16>, vector<384x128xbf16>, vector<256x128xf32> -> vector<256x128xf32>
    %30 = arith.addf %20, %29 : vector<256x128xf32>
    %31 = vector.extract_strided_slice %9 {offsets = [2, 0, 0], sizes = [8, 34, 128], strides = [1, 1, 1]} : vector<10x34x128xbf16> to vector<8x34x128xbf16>
    %32 = vector.extract_strided_slice %31 {offsets = [0, 0, 0], sizes = [8, 32, 128], strides = [1, 1, 1]} : vector<8x34x128xbf16> to vector<8x32x128xbf16>
    %33 = vector.extract_strided_slice %31 {offsets = [0, 1, 0], sizes = [8, 32, 128], strides = [1, 1, 1]} : vector<8x34x128xbf16> to vector<8x32x128xbf16>
    %34 = vector.extract_strided_slice %31 {offsets = [0, 2, 0], sizes = [8, 32, 128], strides = [1, 1, 1]} : vector<8x34x128xbf16> to vector<8x32x128xbf16>
    %35 = tpu.concatenate %32, %33, %34 in 2 : vector<8x32x128xbf16>, vector<8x32x128xbf16>, vector<8x32x128xbf16> -> vector<8x32x384xbf16>
    %36 = vector.shape_cast %35 : vector<8x32x384xbf16> to vector<256x384xbf16>
    %c2 = arith.constant 2 : index
    %c0_14 = arith.constant 0 : index
    %c0_15 = arith.constant 0 : index
    %37 = vector.load %arg4[%c2, %c0_14, %c0_15] : memref<3x384x128xbf16, #tpu.memory_space<vmem>>, vector<1x384x128xbf16>
    %38 = vector.shape_cast %37 : vector<1x384x128xbf16> to vector<384x128xbf16>
    %cst_16 = arith.constant dense<0.000000e+00> : vector<256x128xf32>
    %39 = tpu.matmul %36, %38, %cst_16 {dimension_numbers = #tpu.dot_dimension_numbers<[1], [0], [0], [1], [0, 0, 1, 1], [], []>} : vector<256x384xbf16>, vector<384x128xbf16>, vector<256x128xf32> -> vector<256x128xf32>
    %40 = arith.addf %30, %39 : vector<256x128xf32>
    %c0_17 = arith.constant 0 : index
    %c0_18 = arith.constant 0 : index
    %41 = vector.load %arg5[%c0_17, %c0_18] : memref<1x128xf32, #tpu.memory_space<vmem>>, vector<1x128xf32>
    %42 = vector.shape_cast %41 : vector<1x128xf32> to vector<128xf32>
    %43 = vector.shape_cast %42 : vector<128xf32> to vector<1x128xf32>
    %44 = vector.broadcast %43 : vector<1x128xf32> to vector<256x128xf32>
    %45 = arith.addf %40, %44 : vector<256x128xf32>
    %cst_19 = arith.constant 0.000000e+00 : f32
    %46 = vector.broadcast %cst_19 : f32 to vector<256x128xf32>
    %47 = arith.maximumf %45, %46 : vector<256x128xf32>
    %48 = vector.shape_cast %47 : vector<256x128xf32> to vector<8x32x128xf32>
    %c0_20 = arith.constant 0 : index
    %c0_21 = arith.constant 0 : index
    %c0_22 = arith.constant 0 : index
    %c0_23 = arith.constant 0 : index
    %49 = vector.load %arg6[%c0_20, %c0_21, %c0_22, %c0_23] : memref<1x8x32x128xf32, #tpu.memory_space<vmem>>, vector<1x8x32x128xf32>
    %50 = vector.shape_cast %49 : vector<1x8x32x128xf32> to vector<8x32x128xf32>
    %51 = vector.shape_cast %48 : vector<8x32x128xf32> to vector<1x8x32x128xf32>
    tpu.vector_store %arg6[%c0_20, %c0_21, %c0_22, %c0_23], %51 {strides = array<i32>} : memref<1x8x32x128xf32, #tpu.memory_space<vmem>>, vector<1x8x32x128xf32>,
    return
  }
  func.func @transform_0(%arg0: i32, %arg1: i32) -> (i32, i32, i32, i32) {
    %c0_i32 = arith.constant 0 : i32
    %c0_i32_0 = arith.constant 0 : i32
    %c0_i32_1 = arith.constant 0 : i32
    return %arg0, %arg1, %c0_i32, %c0_i32_0 : i32, i32, i32, i32
  }
  func.func @transform_1(%arg0: i32, %arg1: i32) -> (i32, i32, i32, i32) {
    %c1_i32 = arith.constant 1 : i32
    %0 = arith.addi %arg1, %c1_i32 : i32
    %c2_i32 = arith.constant 2 : i32
    %1 = arith.muli %0, %c2_i32 : i32
    %c0_i32 = arith.constant 0 : i32
    %c0_i32_0 = arith.constant 0 : i32
    %c0_i32_1 = arith.constant 0 : i32
    return %arg0, %1, %c0_i32, %c0_i32_0 : i32, i32, i32, i32
  }
  func.func @transform_2(%arg0: i32, %arg1: i32) -> (i32, i32, i32) {
    %c0_i32 = arith.constant 0 : i32
    %c0_i32_0 = arith.constant 0 : i32
    %c0_i32_1 = arith.constant 0 : i32
    %c0_i32_2 = arith.constant 0 : i32
    return %c0_i32, %c0_i32_0, %c0_i32_1 : i32, i32, i32
  }
  func.func @transform_3(%arg0: i32, %arg1: i32) -> (i32, i32) {
    %c0_i32 = arith.constant 0 : i32
    %c0_i32_0 = arith.constant 0 : i32
    %c0_i32_1 = arith.constant 0 : i32
    return %c0_i32, %c0_i32_0 : i32, i32
  }
  func.func @transform_4(%arg0: i32, %arg1: i32) -> (i32, i32, i32, i32) {
    %c0_i32 = arith.constant 0 : i32
    %c0_i32_0 = arith.constant 0 : i32
    %c0_i32_1 = arith.constant 0 : i32
    return %arg0, %arg1, %c0_i32, %c0_i32_0 : i32, i32, i32, i32
  }
}

</mosaic_0001>

<bundles_post_ra>
// kernel: up_conv_forward.1
= control target key start
LH: loop header
LB: loop body
LE: loop exit
PB: predicated region body
PF: predicated region fallthrough
CT: control target
= control target key end

     0   :  { %s3556_s15 = smov 0   ;;  %s3558_s16 = smov 0   ;;  %s4536_s0 = inlined_call_operand.vmem [shape: bf16[2,18,34,128], index: 0, kind: input, shape index: {}, may-alias: {0,1}]   ;;  %s4537_s1 = inlined_call_operand.vmem [shape: bf16[2,18,34,128], index: 1, kind: input, shape index: {}, may-alias: {0,1}]   ;;  %s4538_s2 = inlined_call_operand.vmem [shape: bf16[3,384,128], index: 2, kind: input, shape index: {}]   ;;  %s4539_s3 = inlined_call_operand.vmem [shape: f32[1,128], index: 3, kind: input, shape index: {}]   ;;  %s4540_s4 = inlined_call_operand.vmem [shape: f32[2,32,32,128], index: 4, kind: output, shape index: {}]  }
   0x1   :  { %s3560_s17 = smov 0   ;;  %s3562_s18 = smov 0  }
   0x2   :  { %s3564_s19 = smov 0  }
   0x3 LB: > { %s23_s20 = sadd.s32 1, %s3521_s17  ;;  %s26_s21 = sadd.s32 1, %s3525_s18  ;;  %s3529_s19 = sphi %s3564_s19, %s14_s19   ;;  %s3525_s18 = sphi %s3562_s18, %s4548_s18   ;;  %s3521_s17 = sphi %s3560_s17, %s4547_s17   ;;  %s3517_s16 = sphi %s3558_s16, %s4546_s16   ;;  %s3513_s15 = sphi %s3556_s15, %s4545_s15  }
   0x4   : > { %p24_p0 = scmp.ge.s32.totalorder %s23_s20, 4  ;;  %p2422_p1 = scmp.ge.s32.totalorder %s3529_s19, 1 }
   0x5   : > { %p220_p2 = scmp.lt.s32.totalorder %s3529_s19, 9 }
   0x6   : > { %s4550_s20 = smov (%p24_p0, %s23_s20), 0  ;;  %s4552_s21 = smov (!%p24_p0, %s26_s21), %s3525_s18 }
   0x7   : > { %p221_p3 = pnand %p2422_p1, %p220_p2  ;;  %p28_p4 = scmp.ge.s32.totalorder %s4552_s21, 2 }
   0x9   : > { %s4554_s21 = smov (%p28_p4, %s4552_s21), 0  ;;  %224 = sbr.rel (%p221_p3) target bundleno = 556 (0x22c), region = 36 }
  0x10   : > { %v3401_v0 = vld [vmem:[%s4538_s2 + $0x100] sm:$0xff]   ;;  %s3594_s24 = sshll.u32 %s3513_s15, 2  ;;  %p279_p5 = scmp.lt.s32.totalorder %s3517_s16, 1  ;;  %v3404_v3 = vld [vmem:[%s4538_s2 + $0x108] sm:$0xff]   ;;  %v3407_v6 = vld [vmem:[%s4538_s2 + $0x110] sm:$0xff]   ;;  %vm537_vm0 = vcmask 1046528  }
  0x11   : > { %v3599_v1 = vld [vmem:[%s4538_s2 + $0x140] sm:$0xff]   ;;  %2630 = vmatprep.subr.bf16.mxu0 %v3401_v0  ;;  %p281_p6 = scmp.lt.s32.totalorder %s3594_s24, 17  ;;  %v3614_v4 = vld [vmem:[%s4538_s2 + $0x148] sm:$0xff]   ;;  %v3629_v7 = vld [vmem:[%s4538_s2 + $0x150] sm:$0xff]   ;;  %s2629_s10 = sadd.s32 4, %s3594_s24 }
  0x12   : > { %v3403_v2 = vld [vmem:[%s4538_s2 + $0xc0] sm:$0xff]   ;;  %3182 = vmatprep.subr.bf16.mxu1 %v3599_v1  ;;  %v3406_v5 = vld [vmem:[%s4538_s2 + $0xc8] sm:$0xff]   ;;  %s4556_s16 = smov (!%p279_p5, %s3517_s16), 1  ;;  %v3409_v8 = vld [vmem:[%s4538_s2 + $0xd0] sm:$0xff]   ;;  %p299_p7 = scmp.lt.s32.totalorder %s2629_s10, 17 }
  0x13   : > { %2631 = vmatpush3.bf16.msra.mxu0 %v3403_v2  ;;  %3190 = vmatpush3.bf16.msra.mxu1 %v3599_v1  ;;  %s282_s13 = scalar_select %p281_p6, %s3594_s24, 17  ;;  %v3410_v9 = vld [vmem:[%s4538_s2 + $0x118] sm:$0xff]   ;;  %v3413_v12 = vld [vmem:[%s4538_s2 + $0x120] sm:$0xff]   ;;  %v3416_v15 = vld [vmem:[%s4538_s2 + $0x128] sm:$0xff]   ;;  %vm426_vm1 = vsmask.f32 7424 }
  0x14   : > { %2632 = vmatprep.subr.bf16.mxu0 %v3404_v3  ;;  %3183 = vmatprep.subr.bf16.mxu1 %v3614_v4  ;;  %v3643_v10 = vld [vmem:[%s4538_s2 + $0x158] sm:$0xff]   ;;  %s3359_s28 = smul.u32 90, %s4556_s16  ;;  %v3657_v13 = vld [vmem:[%s4538_s2 + $0x160] sm:$0xff]   ;;  %v3673_v16 = vld [vmem:[%s4538_s2 + $0x168] sm:$0xff]   ;;  %s4558_s10 = smov (!%p299_p7, %s2629_s10), 17 }
  0x15   : > { %v3412_v11 = vld [vmem:[%s4538_s2 + $0xd8] sm:$0xff]   ;;  %s3358_s5 = smul.u32 5, %s282_s13  ;;  %v3415_v14 = vld [vmem:[%s4538_s2 + $0xe0] sm:$0xff]   ;;  %v3418_v17 = vld [vmem:[%s4538_s2 + $0xe8] sm:$0xff]  }
  0x16   : > { %v3419_v18 = vld [vmem:[%s4538_s2 + $0x130] sm:$0xff]   ;;  %v3422_v21 = vld [vmem:[%s4538_s2 + $0x138] sm:$0xff]   ;;  %s3360_s25 = smul.u32 5, %s4558_s10  ;;  %v3430_v35 = vld [vmem:[%s4538_s2 + $0x40] sm:$0xff]  }
  0x17   : > { %2633 = vmatpush3.bf16.msra.mxu0 %v3406_v5  ;;  %3191 = vmatpush3.bf16.msra.mxu1 %v3614_v4  ;;  %s285_s13 = sadd.s32 %s3359_s28, %s3358_s5  ;;  %v3688_v19 = vld [vmem:[%s4538_s2 + $0x170] sm:$0xff]   ;;  %v3704_v22 = vld [vmem:[%s4538_s2 + $0x178] sm:$0xff]   ;;  %v3431_v41 = vld [vmem:[%s4538_s2] sm:$0xff]  }
  0x18   : > { %2634 = vmatprep.subr.bf16.mxu0 %v3407_v6  ;;  %3184 = vmatprep.subr.bf16.mxu1 %v3629_v7  ;;  %s2424_s24 = sshll.u32 %s285_s13, 2  ;;  %v3421_v20 = vld [vmem:[%s4538_s2 + $0xf0] sm:$0xff]   ;;  %v3424_v25 = vld [vmem:[%s4538_s2 + $0xf8] sm:$0xff]   ;;  %s303_s29 = sadd.s32 %s3360_s25, %s3359_s28  ;;  %v3432_v44 = vld [vmem:[%s4538_s2 + $0x48] sm:$0xff]  }
  0x19   : > { %s3696_s12 = scalar_lea.vmem %s4536_s0, %s2424_s24  ;;  %s2427_s7 = sshll.u32 %s303_s29, 2  ;;  %v3433_v46 = vld [vmem:[%s4538_s2 + $0x8] sm:$0xff]   ;;  %v3435_v49 = vld [vmem:[%s4538_s2 + $0x50] sm:$0xff]   ;;  %v3437_v56 = vld [vmem:[%s4538_s2 + $0x58] sm:$0xff]  }
  0x1a   : > { %v3710_v23 = vld [vmem:[%s3696_s12 + $0x14] sm:$0xff]   ;;  %v3713_v24 = vld [vmem:[%s3696_s12 + $0x1c] sm:$0xff]   ;;  %v3726_v30 = vld [vmem:[%s3696_s12 + $0x44] sm:$0xff]   ;;  %s3773_s14 = scalar_lea.vmem %s4537_s1, %s2427_s7 }
  0x1b   : > { %2635 = vmatpush3.bf16.msra.mxu0 %v3409_v8  ;;  %3192 = vmatpush3.bf16.msra.mxu1 %v3629_v7  ;;  %v448_v26 = vshrl.u32 %v3710_v23, 16  ;;  %v450_v27 = vshll.u32 %v3710_v23, 16  ;;  %v455_v28 = vshll.u32 %v3713_v24, 16  ;;  %v3722_v29 = vld [vmem:[%s3696_s12 + $0x3c] sm:$0xff]   ;;  %v554_v36 = vrot.slane %v3726_v30, 1  ;;  %v3436_v51 = vld [vmem:[%s4538_s2 + $0x10] sm:$0xff]  }
  0x1c   : > { %2636 = vmatprep.subr.bf16.mxu0 %v3410_v9  ;;  %3185 = vmatprep.subr.bf16.mxu1 %v3643_v10  ;;  %v3729_v31 = vld [vmem:[%s3696_s12 + $0x4c] ss:$0 sps:$4 sm:$0x11]   ;;  %v553_v34 = vrot.slane %v3722_v29, 1  ;;  %v459_v42 = vshrl.u32 %v3713_v24, 16  ;;  %v3784_v52 = vld [vmem:[%s3773_s14] sm:$0xff]  }
  0x1d   : > { %v452_v32 = vrot.slane %v450_v27, 1  ;;  %v457_v33 = vrot.slane %v455_v28, 1  ;;  %v556_v37 = vrot.slane %v3729_v31, 1  ;;  %v3761_v45 = vld [vmem:[%s3696_s12 + $0x24] ss:$0 sps:$4 sm:$0x11]  }
  0x1e   : > { %v3742_v39 = vsel %vm537_vm0, %v553_v34, %v554_v36  ;;  %v463_v48 = vshll.u32 %v3761_v45, 16  ;;  %v3790_v54 = vld [vmem:[%s3773_s14 + $0x8] sm:$0xff]   ;;  %v3793_v55 = vld [vmem:[%s3773_s14 + $0x10] ss:$0 sps:$4 sm:$0x11]   ;;  %v558_v57 = vrot.slane %v3784_v52, 1 }
  0x1f   : > { %2637 = vmatpush3.bf16.msra.mxu0 %v3412_v11  ;;  %3193 = vmatpush3.bf16.msra.mxu1 %v3643_v10  ;;  %v453_v38 = vor.u32 %v452_v32, %v448_v26  ;;  %v3745_v40 = vsel %vm537_vm0, %v554_v36, %v556_v37  ;;  %v461_v47 = vor.u32 %v459_v42, %v457_v33  ;;  %v559_v58 = vrot.slane %v3790_v54, 1  ;;  %v3438_v59 = vld [vmem:[%s4538_s2 + $0x18] sm:$0xff]   ;;  %v3442_v62 = vld [vmem:[%s4538_s2 + $0x60] sm:$0xff]   ;;  %v3445_v2 = vld [vmem:[%s4538_s2 + $0x28] sm:$0xff]  }
  0x20   : > { %2638 = vmatprep.subr.bf16.mxu0 %v3413_v12  ;;  %3186 = vmatprep.subr.bf16.mxu1 %v3657_v13  ;;  %v465_v50 = vrot.slane %v463_v48, 1  ;;  %v561_v61 = vrot.slane %v3793_v55, 1  ;;  %v3443_v0 = vld [vmem:[%s4538_s2 + $0x20] sm:$0xff]   ;;  %v3832_v3 = vld [vmem:[%s3696_s12 + $0x28] sm:$0xff]   ;;  %v3841_v5 = vld [vmem:[%s3696_s12 + $0x30] sm:$0xff]  }
  0x21   : > { %v3752_v43 = vsel %vm426_vm1, %v453_v38, %v457_v33  ;;  %3070 = vmatprep.mubr.bf16.mxu1 %v3742_v39  ;;  %v3810_v60 = vsel %vm537_vm0, %v558_v57, %v559_v58  ;;  %v468_v6 = vshrl.u32 %v3832_v3, 16  ;;  %v475_v8 = vshll.u32 %v3841_v5, 16  ;;  %v3452_v9 = vld [vmem:[%s3696_s12] sm:$0xff]   ;;  %v3447_v11 = vld [vmem:[%s4538_s2 + $0x30] sm:$0xff]   ;;  %v3449_v37 = vld [vmem:[%s4538_s2 + $0x38] sm:$0xff]  }
  0x22   : > { %846 = vmatprep.mubr.bf16.mxu0 %v3752_v43  ;;  %v3787_v53 = vsel %vm426_vm1, %v461_v47, %v465_v50  ;;  %v3820_v63 = vsel %vm537_vm0, %v559_v58, %v561_v61  ;;  %v3456_v26 = vld [vmem:[%s3696_s12 + $0x10] ss:$0 sps:$4 sm:$0x11]   ;;  %v479_v32 = vshrl.u32 %v3841_v5, 16  ;;  %v3459_v61 = vld [vmem:[%s4538_s2 + $0x98] sm:$0xff]  }
  0x23   : > { %2639 = vmatpush3.bf16.msra.mxu0 %v3415_v14  ;;  %3194 = vmatpush3.bf16.msra.mxu1 %v3657_v13  ;;  %v3448_v14 = vld [vmem:[%s4538_s2 + $0x78] sm:$0xff]   ;;  %v541_v57 = vrot.slane %v3456_v26, 1 }
  0x24   : > { %2640 = vmatprep.subr.bf16.mxu0 %v3416_v15  ;;  %3187 = vmatprep.subr.bf16.mxu1 %v3673_v16  ;;  %v477_v15 = vrot.slane %v475_v8, 1 }
  0x26   : > { %v481_v42 = vor.u32 %v479_v32, %v477_v15 }
  0x27   : > { %2641 = vmatpush3.bf16.msra.mxu0 %v3418_v17  ;;  %3195 = vmatpush3.bf16.msra.mxu1 %v3673_v16  ;;  %v428_v17 = vshrl.u32 %v3452_v9, 16 }
  0x28   : > { %2642 = vmatprep.subr.bf16.mxu0 %v3419_v18  ;;  %3188 = vmatprep.subr.bf16.mxu1 %v3688_v19  ;;  %v430_v18 = vshll.u32 %v3452_v9, 16 }
  0x2a   : > { %v432_v27 = vrot.slane %v430_v18, 1  ;;  %v510_v18 = vshll.u32 %v3784_v52, 16 }
  0x2b   : > { %2643 = vmatpush3.bf16.msra.mxu0 %v3421_v20  ;;  %3196 = vmatpush3.bf16.msra.mxu1 %v3688_v19 }
  0x2c   : > { %2644 = vmatprep.subr.bf16.mxu0 %v3422_v21  ;;  %3189 = vmatprep.subr.bf16.mxu1 %v3704_v22  ;;  %v433_v36 = vor.u32 %v432_v27, %v428_v17 }
  0x2f   : > { %2645 = vmatpush3.bf16.msra.mxu0 %v3424_v25  ;;  %3197 = vmatpush3.bf16.msra.mxu1 %v3704_v22  ;;  %v3862_v25 = vld [vmem:[%s3696_s12 + $0x38] ss:$0 sps:$4 sm:$0x11]  }
  0x30   : > { %3038 = vmatprep.subr.bf16.mxu0 %v3599_v1  ;;  %2766 = vmatprep.subr.bf16.mxu1 %v3430_v35  ;;  %v483_v35 = vshll.u32 %v3862_v25, 16 }
  0x32   : > { %847 = vmatmul.mubr.bf16.vlgmr.msra.gmra.mrb[0].mxu0 %v3710_v23  ;;  %3071 = vmatmul.mubr.bf16.vlgmr.msra.gmra.mrb[0].mxu1 %v3745_v40 }
  0x33   : > { %3039 = vmatpush3.bf16.msra.mxu0 %v3599_v1  ;;  %2767 = vmatpush3.bf16.msra.mxu1 %v3431_v41  ;;  %v3444_v1 = vld [vmem:[%s4538_s2 + $0x68] sm:$0xff]   ;;  %v3454_v41 = vld [vmem:[%s4538_s2 + $0x80] sm:$0xff]  }
  0x34   : > { %2768 = vmatprep.subr.bf16.mxu1 %v3432_v44  ;;  %3074 = vmatprep.mubr.bf16.mxu1 %v3742_v39  ;;  %v485_v44 = vrot.slane %v483_v35, 1  ;;  %v523_v35 = vshll.u32 %v3793_v55, 16  ;;  %v543_v55 = vrot.slane %v3710_v23, 1 }
  0x35   : > { %3040 = vmatprep.subr.bf16.mxu0 %v3614_v4  ;;  %854 = vmatprep.mubr.bf16.mxu0 %v3787_v53 }
  0x36   : > { %v3885_v48 = vsel %vm426_vm1, %v481_v42, %v485_v44  ;;  %v546_v42 = vrot.slane %v3761_v45, 1  ;;  %v3466_v45 = vld [vmem:[%s4538_s2 + $0x188] sm:$0xff]  }
  0x37   : > { %2769 = vmatpush3.bf16.msra.mxu1 %v3433_v46  ;;  %3041 = vmatpush3.bf16.msra.mxu0 %v3614_v4  ;;  %v3446_v4 = vld [vmem:[%s4538_s2 + $0x70] sm:$0xff]  }
  0x38   : > { %2770 = vmatprep.subr.bf16.mxu1 %v3435_v49  ;;  %3042 = vmatprep.subr.bf16.mxu0 %v3629_v7  ;;  %v3457_v49 = vld [vmem:[%s4538_s2 + $0x88] sm:$0xff]  }
  0x3a   : > { %855 = vmatmul.mubr.bf16.gmra.mrb[4].mxu0 %v3713_v24  ;;  %3075 = vmatmul.mubr.bf16.gmra.mrb[4].mxu1 %v3745_v40 }
  0x3b   : > { %2771 = vmatpush3.bf16.msra.mxu1 %v3436_v51  ;;  %862 = vmatprep.mubr.bf16.mxu0 %v3752_v43  ;;  %v538_v51 = vrot.slane %v3452_v9, 1 }
  0x3c   : > { %2772 = vmatprep.subr.bf16.mxu1 %v3437_v56  ;;  %3078 = vmatprep.mubr.bf16.mxu1 %v3810_v60 }
  0x3d   : > { %3043 = vmatpush3.bf16.msra.mxu0 %v3629_v7  ;;  %v470_v7 = vshll.u32 %v3832_v3, 16 }
  0x3e   : > { %3044 = vmatprep.subr.bf16.mxu0 %v3643_v10 }
  0x3f   : > { %2773 = vmatpush3.bf16.msra.mxu1 %v3438_v59  ;;  %v472_v12 = vrot.slane %v470_v7, 1  ;;  %v3464_v7 = vld [vmem:[%s4538_s2 + $0xb0] sm:$0xff]  }
  0x40   : > { %2774 = vmatprep.subr.bf16.mxu1 %v3442_v62  ;;  %v3460_v62 = vld [vmem:[%s4538_s2 + $0xa0] sm:$0xff]  }
  0x41   : > { %3045 = vmatpush3.bf16.msra.mxu0 %v3643_v10  ;;  %v3850_v10 = vld [vmem:[%s3696_s12 + $0x8] sm:$0xff]   ;;  %v473_v21 = vor.u32 %v472_v12, %v468_v6  ;;  %v3473_v12 = vld [vmem:[%s4538_s2 + $0xb8] sm:$0xff]  }
  0x42   : > { %863 = vmatmul.mubr.bf16.gmra.mrb[8].mxu0 %v3710_v23  ;;  %3079 = vmatmul.mubr.bf16.gmra.mrb[8].mxu1 %v3820_v63  ;;  %v435_v20 = vshll.u32 %v3850_v10, 16  ;;  %v439_v33 = vshrl.u32 %v3850_v10, 16  ;;  %v539_v56 = vrot.slane %v3850_v10, 1 }
  0x43   : > { %2775 = vmatpush3.bf16.msra.mxu1 %v3443_v0  ;;  %870 = vmatprep.mubr.bf16.mxu0 %v3787_v53  ;;  %v3869_v34 = vsel %vm426_vm1, %v473_v21, %v477_v15  ;;  %v495_v0 = vshll.u32 %v3726_v30, 16  ;;  %v512_v21 = vrot.slane %v510_v18, 1 }
  0x44   : > { %2776 = vmatprep.subr.bf16.mxu1 %v3444_v1  ;;  %3082 = vmatprep.mubr.bf16.mxu1 %v3810_v60  ;;  %v437_v28 = vrot.slane %v435_v20, 1  ;;  %v3904_v58 = vsel %vm537_vm0, %v538_v51, %v539_v56  ;;  %v3907_v59 = vsel %vm537_vm0, %v539_v56, %v541_v57  ;;  %v488_v1 = vshrl.u32 %v3722_v29, 16  ;;  %v3468_v51 = vld [vmem:[%s4538_s2 + $0x190] sm:$0xff]   ;;  %v3469_v56 = vld [vmem:[%s4538_s2 + $0x1d8] sm:$0xff]  }
  0x45   : > { %3046 = vmatprep.subr.bf16.mxu0 %v3657_v13  ;;  %v497_v6 = vrot.slane %v495_v0, 1  ;;  %v508_v20 = vshrl.u32 %v3784_v52, 16  ;;  %v3470_v57 = vld [vmem:[%s4538_s2 + $0x198] sm:$0xff]   ;;  %v3472_v0 = vld [vmem:[%s4538_s2 + $0x1a0] sm:$0xff]  }
  0x46   : > { %3047 = vmatpush3.bf16.msra.mxu0 %v3657_v13  ;;  %v443_v13 = vshll.u32 %v3456_v26, 16  ;;  %v438_v38 = vsel %vm426_vm1, %v433_v36, %v437_v28  ;;  %v441_v46 = vor.u32 %v439_v33, %v437_v28  ;;  %v515_v26 = vshll.u32 %v3790_v54, 16 }
  0x47   : > { %2777 = vmatpush3.bf16.msra.mxu1 %v3445_v2  ;;  %3048 = vmatprep.subr.bf16.mxu0 %v3673_v16  ;;  %v513_v27 = vor.u32 %v512_v21, %v508_v20  ;;  %v519_v33 = vshrl.u32 %v3790_v54, 16  ;;  %v525_v36 = vrot.slane %v523_v35, 1 }
  0x48   : > { %2778 = vmatprep.subr.bf16.mxu1 %v3446_v4  ;;  %v445_v47 = vrot.slane %v443_v13, 1  ;;  %v3461_v4 = vld [vmem:[%s4538_s2 + $0xa8] sm:$0xff]   ;;  %v517_v28 = vrot.slane %v515_v26, 1 }
  0x4a   : > { %871 = vmatmul.mubr.bf16.gmra.mrb[12].mxu0 %v3713_v24  ;;  %3083 = vmatmul.mubr.bf16.gmra.mrb[12].mxu1 %v3820_v63  ;;  %v446_v50 = vsel %vm426_vm1, %v441_v46, %v445_v47  ;;  %v3969_v32 = vsel %vm426_vm1, %v513_v27, %v517_v28  ;;  %v521_v13 = vor.u32 %v519_v33, %v517_v28  ;;  %v3463_v46 = vld [vmem:[%s4538_s2 + $0x180] sm:$0xff]   ;;  %v3465_v47 = vld [vmem:[%s4538_s2 + $0x1c8] sm:$0xff]  }
  0x4b   : > { %2779 = vmatpush3.bf16.msra.mxu1 %v3447_v11  ;;  %878 = vmatprep.mubr.bf16.mxu0 %v3869_v34  ;;  %v503_v11 = vshll.u32 %v3729_v31, 16  ;;  %v3947_v31 = vld [vmem:[%s4538_s2 + $0x200] sm:$0xff]  }
  0x4c   : > { %2780 = vmatprep.subr.bf16.mxu1 %v3448_v14  ;;  %3049 = vmatpush3.bf16.msra.mxu0 %v3673_v16  ;;  %v3462_v16 = vld [vmem:[%s4538_s2 + $0x1c0] sm:$0xff]  }
  0x4d   : > { %1312 = vmatprep.mubr.bf16.mxu1 %v438_v38  ;;  %3050 = vmatprep.subr.bf16.mxu0 %v3688_v19  ;;  %v505_v15 = vrot.slane %v503_v11, 1  ;;  %v544_v38 = vrot.slane %v3713_v24, 1 }
  0x4f   : > { %2781 = vmatpush3.bf16.msra.mxu1 %v3449_v37  ;;  %v3978_v37 = vsel %vm426_vm1, %v521_v13, %v525_v36  ;;  %v4003_v44 = vsel %vm537_vm0, %v544_v38, %v546_v42 }
  0x50   : > { %3086 = vmatprep.subr.bf16.mxu1 %v3454_v41  ;;  %3051 = vmatpush3.bf16.msra.mxu0 %v3688_v19  ;;  %v3458_v19 = vld [vmem:[%s4538_s2 + $0x90] sm:$0xff]  }
  0x51   : > { %3052 = vmatprep.subr.bf16.mxu0 %v3704_v22 }
  0x52   : > { %879 = vmatmul.mubr.bf16.gmra.mrb[16].mxu0 %v3832_v3  ;;  %1313 = vmatmul.mubr.bf16.vlgmr.msra.gmra.mrb[16].mxu1 %v3452_v9 }
  0x53   : > { %3087 = vmatpush3.bf16.msra.mxu1 %v3454_v41  ;;  %886 = vmatprep.mubr.bf16.mxu0 %v3885_v48  ;;  %v3995_v41 = vsel %vm537_vm0, %v543_v55, %v544_v38 }
  0x54   : > { %1320 = vmatprep.mubr.bf16.mxu1 %v446_v50  ;;  %3088 = vmatprep.subr.bf16.mxu1 %v3457_v49  ;;  %v548_v50 = vrot.slane %v3832_v3, 1 }
  0x55   : > { %3053 = vmatpush3.bf16.msra.mxu0 %v3704_v22  ;;  %v490_v22 = vshll.u32 %v3722_v29, 16 }
  0x56   : > { %2902 = vmatprep.subr.bf16.mxu0 %v3462_v16  ;;  %v549_v16 = vrot.slane %v3841_v5, 1 }
  0x57   : > { %3089 = vmatpush3.bf16.msra.mxu1 %v3457_v49  ;;  %v492_v2 = vrot.slane %v490_v22, 1  ;;  %v3467_v49 = vld [vmem:[%s4538_s2 + $0x1d0] sm:$0xff]   ;;  %v3471_v22 = vld [vmem:[%s4538_s2 + $0x1e0] sm:$0xff]  }
  0x58   : > { %3090 = vmatprep.subr.bf16.mxu1 %v3458_v19 }
  0x59   : > { %v493_v8 = vor.u32 %v492_v2, %v488_v1  ;;  %v3475_v1 = vld [vmem:[%s4538_s2 + $0x1a8] sm:$0xff]   ;;  %v3476_v2 = vld [vmem:[%s4538_s2 + $0x1f0] sm:$0xff]  }
  0x5a   : > { %887 = vmatmul.mubr.bf16.gmra.mrb[20].mxu0 %v3841_v5  ;;  %1321 = vmatmul.mubr.bf16.gmra.mrb[20].mxu1 %v3850_v10  ;;  %v499_v10 = vshrl.u32 %v3726_v30, 16 }
  0x5b   : > { %894 = vmatprep.mubr.bf16.mxu0 %v3869_v34  ;;  %1328 = vmatprep.mubr.bf16.mxu1 %v3752_v43  ;;  %v3933_v9 = vsel %vm426_vm1, %v493_v8, %v497_v6  ;;  %v3481_v8 = vld [vmem:[%s4538_s2 + $0x208] sm:$0xff]  }
  0x5c   : > { %3091 = vmatpush3.bf16.msra.mxu1 %v3458_v19  ;;  %v501_v14 = vor.u32 %v499_v10, %v497_v6  ;;  %v4030_v19 = vsel %vm537_vm0, %v548_v50, %v549_v16  ;;  %v3478_v6 = vld [vmem:[%s4538_s2 + $0x1f8] sm:$0xff]  }
  0x5d   : > { %3092 = vmatprep.subr.bf16.mxu1 %v3459_v61 }
  0x5e   : > { %v3950_v17 = vsel %vm426_vm1, %v501_v14, %v505_v15 }
  0x60   : > { %3093 = vmatpush3.bf16.msra.mxu1 %v3459_v61  ;;  %v551_v61 = vrot.slane %v3862_v25, 1  ;;  %v3474_v25 = vld [vmem:[%s4538_s2 + $0x1e8] sm:$0xff]  }
  0x61   : > { %3094 = vmatprep.subr.bf16.mxu1 %v3460_v62 }
  0x62   : > { %895 = vmatmul.mubr.bf16.gmra.mrb[24].mxu0 %v3832_v3  ;;  %1329 = vmatmul.mubr.bf16.gmra.mrb[24].mxu1 %v3710_v23 }
  0x63   : > { %902 = vmatprep.mubr.bf16.mxu0 %v3885_v48  ;;  %1336 = vmatprep.mubr.bf16.mxu1 %v3787_v53 }
  0x64   : > { %3095 = vmatpush3.bf16.msra.mxu1 %v3460_v62  ;;  %v4044_v62 = vsel %vm537_vm0, %v549_v16, %v551_v61  ;;  %v4162_v16 = vld [vmem:[%s3773_s14 + $0x14] sm:$0xff]  }
  0x65   : > { %3096 = vmatprep.subr.bf16.mxu1 %v3461_v4 }
  0x68   : > { %3097 = vmatpush3.bf16.msra.mxu1 %v3461_v4  ;;  %v3477_v4 = vld [vmem:[%s4538_s2 + $0x1b0] sm:$0xff]  }
  0x69   : > { %3098 = vmatprep.subr.bf16.mxu1 %v3464_v7 }
  0x6a   : > { %903 = vmatmul.mubr.bf16.gmra.mrb[28].mxu0 %v3841_v5  ;;  %1337 = vmatmul.mubr.bf16.gmra.mrb[28].mxu1 %v3713_v24 }
  0x6b   : > { %910 = vmatprep.mubr.bf16.mxu0 %v3933_v9  ;;  %1344 = vmatprep.mubr.bf16.mxu1 %v3752_v43 }
  0x6c   : > { %3099 = vmatpush3.bf16.msra.mxu1 %v3464_v7  ;;  %v3479_v7 = vld [vmem:[%s4538_s2 + $0x1b8] sm:$0xff]  }
  0x6d   : > { %3100 = vmatprep.subr.bf16.mxu1 %v3473_v12 }
  0x70   : > { %3101 = vmatpush3.bf16.msra.mxu1 %v3473_v12 }
  0x71   : > { %3134 = vmatprep.subr.bf16.mxu1 %v3947_v31 }
  0x72   : > { %911 = vmatmul.mubr.bf16.gmra.mrb[32].mxu0 %v3722_v29  ;;  %1345 = vmatmul.mubr.bf16.gmra.mrb[32].mxu1 %v3710_v23 }
  0x73   : > { %918 = vmatprep.mubr.bf16.mxu0 %v3950_v17  ;;  %1352 = vmatprep.mubr.bf16.mxu1 %v3787_v53 }
  0x7a   : > { %919 = vmatmul.mubr.bf16.gmra.mrb[36].mxu0 %v3726_v30  ;;  %1353 = vmatmul.mubr.bf16.gmra.mrb[36].mxu1 %v3713_v24 }
  0x7b   : > { %926 = vmatprep.mubr.bf16.mxu0 %v3933_v9  ;;  %1360 = vmatprep.mubr.bf16.mxu1 %v3869_v34 }
  0x82   : > { %927 = vmatmul.mubr.bf16.gmra.mrb[40].mxu0 %v3722_v29  ;;  %1361 = vmatmul.mubr.bf16.gmra.mrb[40].mxu1 %v3832_v3 }
  0x83   : > { %934 = vmatprep.mubr.bf16.mxu0 %v3950_v17  ;;  %1368 = vmatprep.mubr.bf16.mxu1 %v3885_v48 }
  0x8a   : > { %935 = vmatmul.mubr.bf16.gmra.mrb[44].mxu0 %v3726_v30  ;;  %1369 = vmatmul.mubr.bf16.gmra.mrb[44].mxu1 %v3841_v5 }
  0x8b   : > { %942 = vmatprep.mubr.bf16.mxu0 %v3969_v32  ;;  %1376 = vmatprep.mubr.bf16.mxu1 %v3869_v34 }
  0x92   : > { %943 = vmatmul.mubr.bf16.gmra.mrb[48].mxu0 %v3784_v52  ;;  %1377 = vmatmul.mubr.bf16.gmra.mrb[48].mxu1 %v3832_v3 }
  0x93   : > { %950 = vmatprep.mubr.bf16.mxu0 %v3978_v37  ;;  %1384 = vmatprep.mubr.bf16.mxu1 %v3885_v48 }
  0x9a   : > { %951 = vmatmul.mubr.bf16.gmra.mrb[52].mxu0 %v3790_v54  ;;  %1385 = vmatmul.mubr.bf16.gmra.mrb[52].mxu1 %v3841_v5 }
  0x9b   : > { %958 = vmatprep.mubr.bf16.mxu0 %v3969_v32  ;;  %1392 = vmatprep.mubr.bf16.mxu1 %v3933_v9 }
  0xa2   : > { %959 = vmatmul.mubr.bf16.gmra.mrb[56].mxu0 %v3784_v52  ;;  %1393 = vmatmul.mubr.bf16.gmra.mrb[56].mxu1 %v3722_v29 }
  0xa3   : > { %966 = vmatprep.mubr.bf16.mxu0 %v3978_v37  ;;  %1400 = vmatprep.mubr.bf16.mxu1 %v3950_v17 }
  0xaa   : > { %967 = vmatmul.mubr.bf16.gmra.mrb[60].mxu0 %v3790_v54  ;;  %1401 = vmatmul.mubr.bf16.gmra.mrb[60].mxu1 %v3726_v30 }
  0xab   : > { %3054 = vmatprep.mubr.bf16.mxu0 %v3995_v41  ;;  %1408 = vmatprep.mubr.bf16.mxu1 %v3933_v9 }
  0xb2   : > { %3055 = vmatmul.mubr.bf16.vlgmr.msra.gmra.mrb[64].mxu0 %v4003_v44  ;;  %1409 = vmatmul.mubr.bf16.gmra.mrb[64].mxu1 %v3722_v29 }
  0xb3   : > { %2903 = vmatpush3.bf16.msra.mxu0 %v3463_v46  ;;  %3058 = vmatprep.mubr.bf16.mxu0 %v3995_v41 }
  0xb4   : > { %2904 = vmatprep.subr.bf16.mxu0 %v3465_v47  ;;  %1416 = vmatprep.mubr.bf16.mxu1 %v3950_v17 }
  0xb7   : > { %2905 = vmatpush3.bf16.msra.mxu0 %v3466_v45 }
  0xb8   : > { %2906 = vmatprep.subr.bf16.mxu0 %v3467_v49 }
  0xba   : > { %3059 = vmatmul.mubr.bf16.gmra.mrb[68].mxu0 %v4003_v44  ;;  %1417 = vmatmul.mubr.bf16.gmra.mrb[68].mxu1 %v3726_v30 }
  0xbb   : > { %2907 = vmatpush3.bf16.msra.mxu0 %v3468_v51  ;;  %3062 = vmatprep.mubr.bf16.mxu0 %v4030_v19 }
  0xbc   : > { %2908 = vmatprep.subr.bf16.mxu0 %v3469_v56  ;;  %1424 = vmatprep.mubr.bf16.mxu1 %v3969_v32 }
  0xbf   : > { %2909 = vmatpush3.bf16.msra.mxu0 %v3470_v57  ;;  %v1620_v57 = vshll.u32 %v4162_v16, 16 }
  0xc0   : > { %2910 = vmatprep.subr.bf16.mxu0 %v3471_v22 }
  0xc2   : > { %3063 = vmatmul.mubr.bf16.gmra.mrb[72].mxu0 %v4044_v62  ;;  %1425 = vmatmul.mubr.bf16.gmra.mrb[72].mxu1 %v3784_v52 }
  0xc3   : > { %2911 = vmatpush3.bf16.msra.mxu0 %v3472_v0  ;;  %3066 = vmatprep.mubr.bf16.mxu0 %v4030_v19 }
  0xc4   : > { %2912 = vmatprep.subr.bf16.mxu0 %v3474_v25  ;;  %1432 = vmatprep.mubr.bf16.mxu1 %v3978_v37 }
  0xc7   : > { %2913 = vmatpush3.bf16.msra.mxu0 %v3475_v1 }
  0xc8   : > { %2914 = vmatprep.subr.bf16.mxu0 %v3476_v2 }
  0xca   : > { %3067 = vmatmul.mubr.bf16.gmra.mrb[76].mxu0 %v4044_v62  ;;  %1433 = vmatmul.mubr.bf16.gmra.mrb[76].mxu1 %v3790_v54 }
  0xcb   : > { %2915 = vmatpush3.bf16.msra.mxu0 %v3477_v4  ;;  %3102 = vmatprep.mubr.bf16.mxu1 %v3904_v58  ;;  %v3483_v58 = vld [vmem:[%s4538_s2 + $0x218] sm:$0xff]  }
  0xcc   : > { %2916 = vmatprep.subr.bf16.mxu0 %v3478_v6  ;;  %1871 = vmatprep.mubr.bf16.mxu0 %v3752_v43  ;;  %v3482_v43 = vld [vmem:[%s4538_s2 + $0x210] sm:$0xff]  }
  0xcf   : > { %2917 = vmatpush3.bf16.msra.mxu0 %v3479_v7 }
  0xd2   : > { %3103 = vmatmul.mubr.bf16.vlgmr.msra.gmra.mrb[80].mxu1 %v3907_v59  ;;  %1872 = vmatmul.mubr.bf16.vlgmr.msra.gmra.mrb[80].mxu0 %v3710_v23  ;;  %v3484_v23 = vld [vmem:[%s4538_s2 + $0x220] sm:$0xff]   ;;  %v3487_v59 = vld [vmem:[%s4538_s2 + $0x238] sm:$0xff]  }
  0xd3   : > { %3135 = vmatpush3.bf16.msra.mxu1 %v3947_v31  ;;  %3106 = vmatprep.mubr.bf16.mxu1 %v3995_v41 }
  0xd4   : > { %1879 = vmatprep.mubr.bf16.mxu0 %v3787_v53  ;;  %3136 = vmatprep.subr.bf16.mxu1 %v3481_v8  ;;  %v3485_v53 = vld [vmem:[%s4538_s2 + $0x228] sm:$0xff]  }
  0xd7   : > { %3137 = vmatpush3.bf16.msra.mxu1 %v3481_v8 }
  0xd8   : > { %3138 = vmatprep.subr.bf16.mxu1 %v3482_v43 }
  0xda   : > { %3107 = vmatmul.mubr.bf16.gmra.mrb[84].mxu1 %v4003_v44  ;;  %1880 = vmatmul.mubr.bf16.gmra.mrb[84].mxu0 %v3713_v24  ;;  %v3486_v24 = vld [vmem:[%s4538_s2 + $0x230] sm:$0xff]  }
  0xdb   : > { %3110 = vmatprep.mubr.bf16.mxu1 %v3995_v41  ;;  %1887 = vmatprep.mubr.bf16.mxu0 %v3869_v34 }
  0xdc   : > { %3139 = vmatpush3.bf16.msra.mxu1 %v3482_v43 }
  0xdd   : > { %3140 = vmatprep.subr.bf16.mxu1 %v3483_v58 }
  0xe0   : > { %3141 = vmatpush3.bf16.msra.mxu1 %v3483_v58 }
  0xe1   : > { %3142 = vmatprep.subr.bf16.mxu1 %v3484_v23 }
  0xe2   : > { %3111 = vmatmul.mubr.bf16.gmra.mrb[88].mxu1 %v4003_v44  ;;  %1888 = vmatmul.mubr.bf16.gmra.mrb[88].mxu0 %v3832_v3 }
  0xe3   : > { %3114 = vmatprep.mubr.bf16.mxu1 %v4030_v19  ;;  %1895 = vmatprep.mubr.bf16.mxu0 %v3885_v48 }
  0xe4   : > { %3143 = vmatpush3.bf16.msra.mxu1 %v3484_v23 }
  0xe5   : > { %3144 = vmatprep.subr.bf16.mxu1 %v3485_v53 }
  0xe8   : > { %3145 = vmatpush3.bf16.msra.mxu1 %v3485_v53 }
  0xe9   : > { %3146 = vmatprep.subr.bf16.mxu1 %v3486_v24 }
  0xea   : > { %3115 = vmatmul.mubr.bf16.gmra.mrb[92].mxu1 %v4044_v62  ;;  %1896 = vmatmul.mubr.bf16.gmra.mrb[92].mxu0 %v3841_v5 }
  0xeb   : > { %3118 = vmatprep.mubr.bf16.mxu1 %v4030_v19  ;;  %1903 = vmatprep.mubr.bf16.mxu0 %v3869_v34 }
  0xec   : > { %3147 = vmatpush3.bf16.msra.mxu1 %v3486_v24  ;;  %v3490_v24 = vld [vmem:[%s3773_s14 + $0x24] ss:$0 sps:$4 sm:$0x11]  }
  0xed   : > { %3148 = vmatprep.subr.bf16.mxu1 %v3487_v59 }
  0xf0   : > { %3149 = vmatpush3.bf16.msra.mxu1 %v3487_v59 }
  0xf2   : > { %3119 = vmatmul.mubr.bf16.gmra.mrb[0].mxu1 %v4044_v62  ;;  %1904 = vmatmul.mubr.bf16.gmra.mrb[96].mxu0 %v3832_v3 }
  0xf3   : > { %3122 = vmatprep.mubr.bf16.mxu1 %v3742_v39  ;;  %1911 = vmatprep.mubr.bf16.mxu0 %v3885_v48 }
  0xfa   : > { %3123 = vmatmul.mubr.bf16.gmra.mrb[4].mxu1 %v3745_v40  ;;  %1912 = vmatmul.mubr.bf16.gmra.mrb[100].mxu0 %v3841_v5 }
  0xfb   : > { %3126 = vmatprep.mubr.bf16.mxu1 %v3742_v39  ;;  %1919 = vmatprep.mubr.bf16.mxu0 %v3933_v9 }
 0x102   : > { %3127 = vmatmul.mubr.bf16.gmra.mrb[8].mxu1 %v3745_v40  ;;  %1920 = vmatmul.mubr.bf16.gmra.mrb[104].mxu0 %v3722_v29 }
 0x103   : > { %3130 = vmatprep.mubr.bf16.mxu1 %v3810_v60  ;;  %1927 = vmatprep.mubr.bf16.mxu0 %v3950_v17 }
 0x105   : > { %v2646_v3 = vpop.f32.mrb[0].mxu0 }
 0x106   : > { %v2647_v34 = vpop.f32.mrb[1].mxu0 }
 0x107   : > { %v4125_v10 = vadd.f32 %v2647_v34, %v2646_v3  ;;  %v2649_v48 = vpop.f32.mrb[2].mxu0 }
 0x108   : > { %v2650_v11 = vpop.f32.mrb[3].mxu0 }
 0x109   : > { %v4127_v12 = vadd.f32 %v2650_v11, %v2649_v48 }
 0x10a   : > { %3131 = vmatmul.mubr.bf16.gmra.mrb[12].mxu1 %v3820_v63  ;;  %1928 = vmatmul.mubr.bf16.gmra.mrb[108].mxu0 %v3726_v30 }
 0x10b   : > { %1935 = vmatprep.mubr.bf16.mxu0 %v3933_v9  ;;  %3150 = vmatprep.mubr.bf16.mxu1 %v3995_v41 }
 0x10d   : > { %v2652_v5 = vpop.f32.mrb[4].mxu0 }
 0x10e   : > { %v2653_v14 = vpop.f32.mrb[5].mxu0 }
 0x10f   : > { %v4133_v15 = vadd.f32 %v2653_v14, %v2652_v5  ;;  %v2655_v31 = vpop.f32.mrb[6].mxu0 }
 0x110   : > { %v2656_v18 = vpop.f32.mrb[7].mxu0 }
 0x111   : > { %v4135_v20 = vadd.f32 %v2656_v18, %v2655_v31 }
 0x112   : > { %1936 = vmatmul.mubr.bf16.gmra.mrb[112].mxu0 %v3722_v29  ;;  %3151 = vmatmul.mubr.bf16.vlgmr.msra.gmra.mrb[80].mxu1 %v4003_v44 }
 0x113   : > { %1943 = vmatprep.mubr.bf16.mxu0 %v3950_v17  ;;  %3154 = vmatprep.mubr.bf16.mxu1 %v4030_v19 }
 0x115   : > { %v2658_v21 = vpop.f32.mrb[8].mxu0 }
 0x116   : > { %v2659_v9 = vpop.f32.mrb[9].mxu0 }
 0x117   : > { %v4141_v26 = vadd.f32 %v2659_v9, %v2658_v21  ;;  %v2661_v27 = vpop.f32.mrb[10].mxu0  ;;  %v1633_v21 = vshll.u32 %v3490_v24, 16 }
 0x118   : > { %v2662_v28 = vpop.f32.mrb[11].mxu0 }
 0x119   : > { %v4143_v33 = vadd.f32 %v2662_v28, %v2661_v27 }
 0x11a   : > { %1944 = vmatmul.mubr.bf16.gmra.mrb[116].mxu0 %v3726_v30  ;;  %3155 = vmatmul.mubr.bf16.gmra.mrb[84].mxu1 %v4044_v62 }
 0x11b   : > { %1951 = vmatprep.mubr.bf16.mxu0 %v3969_v32  ;;  %3158 = vmatprep.mubr.bf16.mxu1 %v4030_v19  ;;  %v4173_v19 = vld [vmem:[%s3773_s14 + $0x1c] sm:$0xff]   ;;  %s2428_s14 = sshll.u32 %s3513_s15, 3  ;;  %s2430_s15 = sshll.u32 %s4556_s16, 7 }
 0x11c   : > { %v1625_v8 = vshll.u32 %v4173_v19, 16  ;;  %p312_p8 = scmp.lt.s32.totalorder %s2428_s14, 31 }
 0x11d   : > { %v2664_v29 = vpop.f32.mrb[12].mxu0 }
 0x11e   : > { %v2665_v17 = vpop.f32.mrb[13].mxu0  ;;  %v1627_v53 = vrot.slane %v1625_v8, 1  ;;  %s4560_s14 = smov (!%p312_p8, %s2428_s14), 31 }
 0x11f   : > { %v4149_v35 = vadd.f32 %v2665_v17, %v2664_v29  ;;  %v2667_v13 = vpop.f32.mrb[14].mxu0  ;;  %v1635_v29 = vrot.slane %v1633_v21, 1  ;;  %v1639_v17 = vrot.slane %v4162_v16, 1  ;;  %s2429_s13 = sshll.u32 %s4560_s14, 2 }
 0x120   : > { %v2668_v36 = vpop.f32.mrb[15].mxu0  ;;  %s316_s22 = sadd.s32 %s2430_s15, %s2429_s13 }
 0x121   : > { %v4151_v55 = vadd.f32 %v2668_v36, %v2667_v13  ;;  %v1640_v13 = vrot.slane %v4173_v19, 1  ;;  %s2431_s24 = sshll.u32 %s316_s22, 3 }
 0x122   : > { %1952 = vmatmul.mubr.bf16.gmra.mrb[120].mxu0 %v3784_v52  ;;  %3159 = vmatmul.mubr.bf16.gmra.mrb[88].mxu1 %v4044_v62  ;;  %s4409_s12 = scalar_lea.vmem %s4540_s4, %s2431_s24 }
 0x123   : > { %1959 = vmatprep.mubr.bf16.mxu0 %v3978_v37  ;;  %3162 = vmatprep.mubr.bf16.mxu1 %v3742_v39 }
 0x125   : > { %v2670_v30 = vpop.f32.mrb[16].mxu0  ;;  %v2782_v38 = vpop.f32.mrb[16].mxu1 }
 0x126   : > { %v2671_v41 = vpop.f32.mrb[17].mxu0  ;;  %v2783_v42 = vpop.f32.mrb[17].mxu1 }
 0x127   : > { %v4157_v44 = vadd.f32 %v2671_v41, %v2670_v30  ;;  %v2673_v46 = vpop.f32.mrb[18].mxu0  ;;  %v4159_v47 = vadd.f32 %v2783_v42, %v2782_v38  ;;  %v2785_v45 = vpop.f32.mrb[18].mxu1 }
 0x128   : > { %v2674_v49 = vpop.f32.mrb[19].mxu0  ;;  %v2786_v50 = vpop.f32.mrb[19].mxu1 }
 0x129   : > { %v4164_v51 = vadd.f32 %v2674_v49, %v2673_v46  ;;  %v4166_v56 = vadd.f32 %v2786_v50, %v2785_v45 }
 0x12a   : > { %1960 = vmatmul.mubr.bf16.gmra.mrb[124].mxu0 %v3790_v54  ;;  %3163 = vmatmul.mubr.bf16.gmra.mrb[92].mxu1 %v3745_v40 }
 0x12b   : > { %1967 = vmatprep.mubr.bf16.mxu0 %v3969_v32  ;;  %3166 = vmatprep.mubr.bf16.mxu1 %v3742_v39  ;;  %v1618_v32 = vshrl.u32 %v4162_v16, 16  ;;  %v1622_v39 = vrot.slane %v1620_v57, 1  ;;  %v1641_v57 = vsel %vm537_vm0, %v1639_v17, %v1640_v13 }
 0x12d   : > { %v2676_v61 = vpop.f32.mrb[20].mxu0  ;;  %v2788_v22 = vpop.f32.mrb[20].mxu1  ;;  %v1623_v23 = vor.u32 %v1622_v39, %v1618_v32 }
 0x12e   : > { %v2677_v62 = vpop.f32.mrb[21].mxu0  ;;  %v2789_v0 = vpop.f32.mrb[21].mxu1 }
 0x12f   : > { %v4176_v25 = vadd.f32 %v2677_v62, %v2676_v61  ;;  %v2679_v1 = vpop.f32.mrb[22].mxu0  ;;  %v4178_v2 = vadd.f32 %v2789_v0, %v2788_v22  ;;  %v2791_v4 = vpop.f32.mrb[22].mxu1  ;;  %v1642_v62 = vrot.slane %v3490_v24, 1 }
 0x130   : > { %v2680_v6 = vpop.f32.mrb[23].mxu0  ;;  %v2792_v7 = vpop.f32.mrb[23].mxu1 }
 0x131   : > { %v4182_v43 = vadd.f32 %v2680_v6, %v2679_v1  ;;  %v4184_v58 = vadd.f32 %v2792_v7, %v2791_v4 }
 0x132   : > { %1968 = vmatmul.mubr.bf16.gmra.mrb[128].mxu0 %v3784_v52  ;;  %3167 = vmatmul.mubr.bf16.gmra.mrb[0].mxu1 %v3745_v40  ;;  %v1628_v40 = vsel %vm426_vm1, %v1623_v23, %v1627_v53  ;;  %v1643_v23 = vsel %vm537_vm0, %v1640_v13, %v1642_v62 }
 0x133   : > { %1975 = vmatprep.mubr.bf16.mxu0 %v3978_v37  ;;  %3170 = vmatprep.mubr.bf16.mxu1 %v3810_v60  ;;  %v1629_v37 = vshrl.u32 %v4173_v19, 16 }
 0x135   : > { %v2682_v59 = vpop.f32.mrb[24].mxu0  ;;  %v2794_v3 = vpop.f32.mrb[24].mxu1  ;;  %v1631_v28 = vor.u32 %v1629_v37, %v1627_v53 }
 0x136   : > { %v2683_v34 = vpop.f32.mrb[25].mxu0  ;;  %v2795_v48 = vpop.f32.mrb[25].mxu1 }
 0x137   : > { %v4191_v11 = vadd.f32 %v2683_v34, %v2682_v59  ;;  %v2685_v5 = vpop.f32.mrb[26].mxu0  ;;  %v4193_v14 = vadd.f32 %v2795_v48, %v2794_v3  ;;  %v2797_v31 = vpop.f32.mrb[26].mxu1 }
 0x138   : > { %v2686_v52 = vpop.f32.mrb[27].mxu0  ;;  %v2798_v18 = vpop.f32.mrb[27].mxu1 }
 0x139   : > { %v4197_v9 = vadd.f32 %v2686_v52, %v2685_v5  ;;  %v4199_v27 = vadd.f32 %v2798_v18, %v2797_v31 }
 0x13a   : > { %1976 = vmatmul.mubr.bf16.gmra.mrb[132].mxu0 %v3790_v54  ;;  %3171 = vmatmul.mubr.bf16.gmra.mrb[4].mxu1 %v3820_v63 }
 0x13b   : > { %1983 = vmatprep.mubr.bf16.mxu0 %v1628_v40  ;;  %3174 = vmatprep.mubr.bf16.mxu1 %v3810_v60  ;;  %v1636_v60 = vsel %vm426_vm1, %v1631_v28, %v1635_v29 }
 0x13d   : > { %v2688_v36 = vpop.f32.mrb[28].mxu0  ;;  %v2800_v30 = vpop.f32.mrb[28].mxu1 }
 0x13e   : > { %v2689_v38 = vpop.f32.mrb[29].mxu0  ;;  %v2801_v41 = vpop.f32.mrb[29].mxu1 }
 0x13f   : > { %v4206_v42 = vadd.f32 %v2689_v38, %v2688_v36  ;;  %v2691_v46 = vpop.f32.mrb[30].mxu0  ;;  %v4208_v45 = vadd.f32 %v2801_v41, %v2800_v30  ;;  %v2803_v54 = vpop.f32.mrb[30].mxu1 }
 0x140   : > { %v2692_v49 = vpop.f32.mrb[31].mxu0  ;;  %v2804_v50 = vpop.f32.mrb[31].mxu1 }
 0x141   : > { %v4212_v61 = vadd.f32 %v2692_v49, %v2691_v46  ;;  %v4214_v22 = vadd.f32 %v2804_v50, %v2803_v54 }
 0x142   : > { %1984 = vmatmul.mubr.bf16.gmra.mrb[136].mxu0 %v4162_v16  ;;  %3175 = vmatmul.mubr.bf16.gmra.mrb[8].mxu1 %v3820_v63 }
 0x143   : > { %1991 = vmatprep.mubr.bf16.mxu0 %v1636_v60  ;;  %3178 = vmatprep.mubr.bf16.mxu1 %v1641_v57 }
 0x145   : > { %v2694_v0 = vpop.f32.mrb[32].mxu0  ;;  %v2806_v1 = vpop.f32.mrb[32].mxu1 }
 0x146   : > { %v2695_v4 = vpop.f32.mrb[33].mxu0  ;;  %v2807_v6 = vpop.f32.mrb[33].mxu1 }
 0x147   : > { %v2696_v7 = vadd.f32 %v2695_v4, %v2694_v0  ;;  %v2697_v32 = vpop.f32.mrb[34].mxu0  ;;  %v4218_v39 = vadd.f32 %v2807_v6, %v2806_v1  ;;  %v2809_v8 = vpop.f32.mrb[34].mxu1 }
 0x148   : > { %v2698_v53 = vpop.f32.mrb[35].mxu0  ;;  %v2810_v59 = vpop.f32.mrb[35].mxu1 }
 0x149   : > { %v2699_v3 = vadd.f32 %v2698_v53, %v2697_v32  ;;  %v4221_v16 = vadd.f32 %v2810_v59, %v2809_v8 }
 0x14a   : > { %1992 = vmatmul.mubr.bf16.gmra.mrb[140].mxu0 %v4173_v19  ;;  %3179 = vmatmul.mubr.bf16.gmra.mrb[12].mxu1 %v1643_v23 }
 0x14d   : > { %v2700_v63 = vpop.f32.mrb[36].mxu0  ;;  %v2812_v24 = vpop.f32.mrb[36].mxu1 }
 0x14e   : > { %v2701_v34 = vpop.f32.mrb[37].mxu0  ;;  %v2813_v48 = vpop.f32.mrb[37].mxu1 }
 0x14f   : > { %v2702_v5 = vadd.f32 %v2701_v34, %v2700_v63  ;;  %v2703_v31 = vpop.f32.mrb[38].mxu0  ;;  %v4224_v52 = vadd.f32 %v2813_v48, %v2812_v24  ;;  %v2815_v18 = vpop.f32.mrb[38].mxu1 }
 0x150   : > { %v2704_v40 = vpop.f32.mrb[39].mxu0  ;;  %v2816_v37 = vpop.f32.mrb[39].mxu1 }
 0x151   : > { %v2705_v21 = vadd.f32 %v2704_v40, %v2703_v31  ;;  %v4226_v28 = vadd.f32 %v2816_v37, %v2815_v18 }
 0x155   : > { %v2706_v29 = vpop.f32.mrb[40].mxu0  ;;  %v2818_v17 = vpop.f32.mrb[40].mxu1 }
 0x156   : > { %v2707_v13 = vpop.f32.mrb[41].mxu0  ;;  %v2819_v36 = vpop.f32.mrb[41].mxu1 }
 0x157   : > { %v2708_v19 = vadd.f32 %v2707_v13, %v2706_v29  ;;  %v2709_v30 = vpop.f32.mrb[42].mxu0  ;;  %v4228_v38 = vadd.f32 %v2819_v36, %v2818_v17  ;;  %v2821_v41 = vpop.f32.mrb[42].mxu1 }
 0x158   : > { %v2710_v46 = vpop.f32.mrb[43].mxu0  ;;  %v2822_v54 = vpop.f32.mrb[43].mxu1 }
 0x159   : > { %v2711_v49 = vadd.f32 %v2710_v46, %v2709_v30  ;;  %v4230_v50 = vadd.f32 %v2822_v54, %v2821_v41 }
 0x15d   : > { %v2712_v60 = vpop.f32.mrb[44].mxu0  ;;  %v2824_v57 = vpop.f32.mrb[44].mxu1 }
 0x15e   : > { %v2713_v62 = vpop.f32.mrb[45].mxu0  ;;  %v2825_v0 = vpop.f32.mrb[45].mxu1 }
 0x15f   : > { %v2714_v1 = vadd.f32 %v2713_v62, %v2712_v60  ;;  %v2715_v4 = vpop.f32.mrb[46].mxu0  ;;  %v4232_v6 = vadd.f32 %v2825_v0, %v2824_v57  ;;  %v2827_v32 = vpop.f32.mrb[46].mxu1 }
 0x160   : > { %v2716_v8 = vpop.f32.mrb[47].mxu0  ;;  %v2828_v23 = vpop.f32.mrb[47].mxu1 }
 0x161   : > { %v2717_v53 = vadd.f32 %v2716_v8, %v2715_v4  ;;  %v4234_v59 = vadd.f32 %v2828_v23, %v2827_v32 }
 0x165   : > { %v2718_v63 = vpop.f32.mrb[48].mxu0  ;;  %v2830_v24 = vpop.f32.mrb[48].mxu1 }
 0x166   : > { %v2719_v34 = vpop.f32.mrb[49].mxu0  ;;  %v2831_v48 = vpop.f32.mrb[49].mxu1 }
 0x167   : > { %v4236_v31 = vadd.f32 %v2719_v34, %v2718_v63  ;;  %v2832_v18 = vadd.f32 %v2831_v48, %v2830_v24  ;;  %v2721_v40 = vpop.f32.mrb[50].mxu0  ;;  %v2833_v37 = vpop.f32.mrb[50].mxu1 }
 0x168   : > { %v2722_v29 = vpop.f32.mrb[51].mxu0  ;;  %v2834_v17 = vpop.f32.mrb[51].mxu1 }
 0x169   : > { %v4238_v13 = vadd.f32 %v2832_v18, %v2696_v7  ;;  %v4240_v36 = vadd.f32 %v2722_v29, %v2721_v40  ;;  %v2835_v30 = vadd.f32 %v2834_v17, %v2833_v37 }
 0x16b   : > { %v4242_v41 = vadd.f32 %v2835_v30, %v2699_v3 }
 0x16d   : > { %v2724_v46 = vpop.f32.mrb[52].mxu0  ;;  %v2836_v54 = vpop.f32.mrb[52].mxu1 }
 0x16e   : > { %v2725_v60 = vpop.f32.mrb[53].mxu0  ;;  %v2837_v57 = vpop.f32.mrb[53].mxu1 }
 0x16f   : > { %v4244_v62 = vadd.f32 %v2725_v60, %v2724_v46  ;;  %v2838_v0 = vadd.f32 %v2837_v57, %v2836_v54  ;;  %v2727_v4 = vpop.f32.mrb[54].mxu0  ;;  %v2839_v32 = vpop.f32.mrb[54].mxu1 }
 0x170   : > { %v2728_v8 = vpop.f32.mrb[55].mxu0  ;;  %v2840_v23 = vpop.f32.mrb[55].mxu1 }
 0x171   : > { %v4246_v63 = vadd.f32 %v2838_v0, %v2702_v5  ;;  %v4248_v7 = vadd.f32 %v2728_v8, %v2727_v4  ;;  %v2841_v24 = vadd.f32 %v2840_v23, %v2839_v32 }
 0x173   : > { %v4250_v34 = vadd.f32 %v2841_v24, %v2705_v21 }
 0x175   : > { %4541 = vst [vmem:[#allocation2_spill] sm:$0xff] %v4250_v34  ;;  %v2730_v3 = vpop.f32.mrb[56].mxu0  ;;  %v2842_v48 = vpop.f32.mrb[56].mxu1 }
 0x176   : > { %v2731_v18 = vpop.f32.mrb[57].mxu0  ;;  %v2843_v40 = vpop.f32.mrb[57].mxu1 }
 0x177   : > { %v4252_v37 = vadd.f32 %v2731_v18, %v2730_v3  ;;  %v2844_v29 = vadd.f32 %v2843_v40, %v2842_v48  ;;  %v2733_v17 = vpop.f32.mrb[58].mxu0  ;;  %v2845_v30 = vpop.f32.mrb[58].mxu1 }
 0x178   : > { %v2734_v46 = vpop.f32.mrb[59].mxu0  ;;  %v2846_v54 = vpop.f32.mrb[59].mxu1 }
 0x179   : > { %v4254_v60 = vadd.f32 %v2844_v29, %v2708_v19  ;;  %v4256_v5 = vadd.f32 %v2734_v46, %v2733_v17  ;;  %v2847_v57 = vadd.f32 %v2846_v54, %v2845_v30 }
 0x17b   : > { %v4258_v0 = vadd.f32 %v2847_v57, %v2711_v49 }
 0x17d   : > { %4542 = vst [vmem:[#allocation3_spill] sm:$0xff] %v4258_v0  ;;  %v2736_v21 = vpop.f32.mrb[60].mxu0  ;;  %v2848_v4 = vpop.f32.mrb[60].mxu1 }
 0x17e   : > { %v2737_v32 = vpop.f32.mrb[61].mxu0  ;;  %v2849_v8 = vpop.f32.mrb[61].mxu1 }
 0x17f   : > { %v4260_v23 = vadd.f32 %v2737_v32, %v2736_v21  ;;  %v2850_v24 = vadd.f32 %v2849_v8, %v2848_v4  ;;  %v2739_v3 = vpop.f32.mrb[62].mxu0  ;;  %v2851_v48 = vpop.f32.mrb[62].mxu1 }
 0x180   : > { %v2740_v18 = vpop.f32.mrb[63].mxu0  ;;  %v2852_v40 = vpop.f32.mrb[63].mxu1 }
 0x181   : > { %v4262_v34 = vadd.f32 %v2850_v24, %v2714_v1  ;;  %v4264_v19 = vadd.f32 %v2740_v18, %v2739_v3  ;;  %v2853_v29 = vadd.f32 %v2852_v40, %v2851_v48 }
 0x183   : > { %v4266_v17 = vadd.f32 %v2853_v29, %v2717_v53 }
 0x185   : > { %v3056_v49 = vpop.f32.mrb[64].mxu0  ;;  %v2854_v30 = vpop.f32.mrb[64].mxu1 }
 0x186   : > { %v1018_v46 = vadd.f32 %v3056_v49, %v4133_v15  ;;  %v1009_v54 = vpop.f32.mrb[65].mxu0  ;;  %v2855_v57 = vpop.f32.mrb[65].mxu1 }
 0x187   : > { %v1010_v21 = vadd.f32 %v4125_v10, %v1009_v54  ;;  %v2856_v4 = vadd.f32 %v2855_v57, %v2854_v30  ;;  %v3057_v32 = vpop.f32.mrb[66].mxu0  ;;  %v2857_v8 = vpop.f32.mrb[66].mxu1 }
 0x188   : > { %v4271_v0 = vadd.f32 %v4178_v2, %v1018_v46  ;;  %v1021_v1 = vadd.f32 %v3057_v32, %v4135_v20  ;;  %v1012_v24 = vpop.f32.mrb[67].mxu0  ;;  %v2858_v3 = vpop.f32.mrb[67].mxu1 }
 0x189   : > { %v4275_v53 = vadd.f32 %v4159_v47, %v1010_v21  ;;  %v4278_v48 = vadd.f32 %v2856_v4, %v4236_v31  ;;  %v1013_v15 = vadd.f32 %v4127_v12, %v1012_v24  ;;  %v2859_v18 = vadd.f32 %v2858_v3, %v2857_v8 }
 0x18a   : > { %v4282_v10 = vadd.f32 %v4184_v58, %v1021_v1 }
 0x18b   : > { %v4285_v40 = vadd.f32 %v4166_v56, %v1013_v15  ;;  %v4288_v2 = vadd.f32 %v2859_v18, %v4240_v36 }
 0x18d   : > { %v3060_v20 = vpop.f32.mrb[68].mxu0  ;;  %v2860_v29 = vpop.f32.mrb[68].mxu1 }
 0x18e   : > { %v1034_v47 = vadd.f32 %v3060_v20, %v4149_v35  ;;  %v1025_v49 = vpop.f32.mrb[69].mxu0  ;;  %v2861_v30 = vpop.f32.mrb[69].mxu1 }
 0x18f   : > { %v1026_v31 = vadd.f32 %v4141_v26, %v1025_v49  ;;  %v2862_v46 = vadd.f32 %v2861_v30, %v2860_v29  ;;  %v3061_v12 = vpop.f32.mrb[70].mxu0  ;;  %v2863_v54 = vpop.f32.mrb[70].mxu1 }
 0x190   : > { %v4293_v58 = vadd.f32 %v4208_v45, %v1034_v47  ;;  %v1037_v56 = vadd.f32 %v3061_v12, %v4151_v55  ;;  %v1028_v57 = vpop.f32.mrb[71].mxu0  ;;  %v2864_v21 = vpop.f32.mrb[71].mxu1 }
 0x191   : > { %v4297_v36 = vadd.f32 %v4193_v14, %v1026_v31  ;;  %v4300_v4 = vadd.f32 %v2862_v46, %v4244_v62  ;;  %v1029_v35 = vadd.f32 %v4143_v33, %v1028_v57  ;;  %v2865_v32 = vadd.f32 %v2864_v21, %v2863_v54 }
 0x192   : > { %v4304_v26 = vadd.f32 %v4214_v22, %v1037_v56 }
 0x193   : > { %v4307_v8 = vadd.f32 %v4199_v27, %v1029_v35  ;;  %v4310_v45 = vadd.f32 %v2865_v32, %v4248_v7 }
 0x195   : > { %v3064_v55 = vpop.f32.mrb[72].mxu0  ;;  %v2866_v1 = vpop.f32.mrb[72].mxu1 }
 0x196   : > { %v1050_v14 = vadd.f32 %v3064_v55, %v4176_v25  ;;  %v1041_v24 = vpop.f32.mrb[73].mxu0  ;;  %v2867_v3 = vpop.f32.mrb[73].mxu1 }
 0x197   : > { %v1042_v62 = vadd.f32 %v4157_v44, %v1041_v24  ;;  %v2868_v15 = vadd.f32 %v2867_v3, %v2866_v1  ;;  %v3065_v33 = vpop.f32.mrb[74].mxu0  ;;  %v2869_v18 = vpop.f32.mrb[74].mxu1 }
 0x198   : > { %v4315_v22 = vadd.f32 %v4224_v52, %v1050_v14  ;;  %v1053_v27 = vadd.f32 %v3065_v33, %v4182_v43  ;;  %v1044_v20 = vpop.f32.mrb[75].mxu0  ;;  %v2870_v29 = vpop.f32.mrb[75].mxu1 }
 0x199   : > { %v4319_v7 = vadd.f32 %v4218_v39, %v1042_v62  ;;  %v4322_v47 = vadd.f32 %v2868_v15, %v4252_v37  ;;  %v1045_v25 = vadd.f32 %v4164_v51, %v1044_v20  ;;  %v2871_v49 = vadd.f32 %v2870_v29, %v2869_v18 }
 0x19a   : > { %v4326_v44 = vadd.f32 %v4226_v28, %v1053_v27 }
 0x19b   : > { %v1350_v30 = vadd.f32 %v4221_v16, %v1045_v25  ;;  %v4330_v52 = vadd.f32 %v2871_v49, %v4256_v5 }
 0x19d   : > { %v3068_v43 = vpop.f32.mrb[76].mxu0  ;;  %v2872_v31 = vpop.f32.mrb[76].mxu1 }
 0x19e   : > { %v1066_v46 = vadd.f32 %v3068_v43, %v4206_v42  ;;  %v1057_v39 = vpop.f32.mrb[77].mxu0  ;;  %v2873_v12 = vpop.f32.mrb[77].mxu1 }
 0x19f   : > { %v1058_v37 = vadd.f32 %v4191_v11, %v1057_v39  ;;  %v2874_v54 = vadd.f32 %v2873_v12, %v2872_v31  ;;  %v3069_v56 = vpop.f32.mrb[78].mxu0  ;;  %v2875_v51 = vpop.f32.mrb[78].mxu1 }
 0x1a0   : > { %v4335_v57 = vadd.f32 %v4232_v6, %v1066_v46  ;;  %v1069_v28 = vadd.f32 %v3069_v56, %v4212_v61  ;;  %v1060_v16 = vpop.f32.mrb[79].mxu0  ;;  %v2876_v21 = vpop.f32.mrb[79].mxu1 }
 0x1a1   : > { %v4339_v5 = vadd.f32 %v4228_v38, %v1058_v37  ;;  %v4342_v35 = vadd.f32 %v2874_v54, %v4260_v23  ;;  %v1061_v42 = vadd.f32 %v4197_v9, %v1060_v16  ;;  %v2877_v32 = vadd.f32 %v2876_v21, %v2875_v51 }
 0x1a2   : > { %v4346_v11 = vadd.f32 %v4234_v59, %v1069_v28 }
 0x1a3   : > { %v1366_v55 = vadd.f32 %v4230_v50, %v1061_v42  ;;  %v4350_v6 = vadd.f32 %v2877_v32, %v4264_v19 }
 0x1a5   : > { %v2918_v61 = vpop.f32.mrb[80].mxu0 }
 0x1a6   : > { %v2919_v1 = vpop.f32.mrb[81].mxu0 }
 0x1a7   : > { %v2920_v14 = vadd.f32 %v2919_v1, %v2918_v61  ;;  %v2921_v24 = vpop.f32.mrb[82].mxu0 }
 0x1a8   : > { %v2922_v38 = vpop.f32.mrb[83].mxu0 }
 0x1a9   : > { %v2923_v3 = vadd.f32 %v2922_v38, %v2921_v24  ;;  %v4353_v23 = vadd.f32 %v2920_v14, %v4275_v53 }
 0x1ab   : > { %v4356_v9 = vadd.f32 %v2923_v3, %v4285_v40 }
 0x1ad   : > { %v2924_v62 = vpop.f32.mrb[84].mxu0 }
 0x1ae   : > { %v2925_v59 = vpop.f32.mrb[85].mxu0 }
 0x1af   : > { %v2926_v15 = vadd.f32 %v2925_v59, %v2924_v62  ;;  %v2927_v33 = vpop.f32.mrb[86].mxu0 }
 0x1b0   : > { %v2928_v50 = vpop.f32.mrb[87].mxu0 }
 0x1b1   : > { %v2929_v18 = vadd.f32 %v2928_v50, %v2927_v33  ;;  %v3200_v19 = vadd.f32 %v2926_v15, %v4271_v0 }
 0x1b3   : > { %v4360_v27 = vadd.f32 %v2929_v18, %v4282_v10 }
 0x1b5   : > { %v2930_v20 = vpop.f32.mrb[88].mxu0 }
 0x1b6   : > { %v2931_v29 = vpop.f32.mrb[89].mxu0 }
 0x1b7   : > { %v2932_v25 = vadd.f32 %v2931_v29, %v2930_v20  ;;  %v2933_v49 = vpop.f32.mrb[90].mxu0 }
 0x1b8   : > { %v2934_v53 = vpop.f32.mrb[91].mxu0 }
 0x1b9   : > { %v2935_v43 = vadd.f32 %v2934_v53, %v2933_v49  ;;  %v4363_v40 = vadd.f32 %v2932_v25, %v4297_v36 }
 0x1bb   : > { %v4366_v31 = vadd.f32 %v2935_v43, %v4307_v8 }
 0x1bd   : > { %v2936_v46 = vpop.f32.mrb[92].mxu0 }
 0x1be   : > { %v2937_v39 = vpop.f32.mrb[93].mxu0 }
 0x1bf   : > { %v2938_v12 = vadd.f32 %v2937_v39, %v2936_v46  ;;  %v2939_v37 = vpop.f32.mrb[94].mxu0 }
 0x1c0   : > { %v2940_v0 = vpop.f32.mrb[95].mxu0 }
 0x1c1   : > { %v2941_v54 = vadd.f32 %v2940_v0, %v2939_v37  ;;  %v4369_v10 = vadd.f32 %v2938_v12, %v4293_v58 }
 0x1c3   : > { %v4372_v56 = vadd.f32 %v2941_v54, %v4304_v26 }
 0x1c5   : > { %v2942_v51 = vpop.f32.mrb[96].mxu0 }
 0x1c6   : > { %v2943_v28 = vpop.f32.mrb[97].mxu0 }
 0x1c7   : > { %v2944_v36 = vadd.f32 %v2943_v28, %v2942_v51  ;;  %v2945_v16 = vpop.f32.mrb[98].mxu0 }
 0x1c8   : > { %v2946_v21 = vpop.f32.mrb[99].mxu0 }
 0x1c9   : > { %v2947_v8 = vadd.f32 %v2946_v21, %v2945_v16  ;;  %v4375_v42 = vadd.f32 %v2944_v36, %v4319_v7 }
 0x1cb   : > { %v4377_v32 = vadd.f32 %v2947_v8, %v1350_v30 }
 0x1cd   : > { %v2948_v61 = vpop.f32.mrb[100].mxu0 }
 0x1ce   : > { %v2949_v1 = vpop.f32.mrb[101].mxu0 }
 0x1cf   : > { %v2950_v14 = vadd.f32 %v2949_v1, %v2948_v61  ;;  %v2951_v58 = vpop.f32.mrb[102].mxu0 }
 0x1d0   : > { %v2952_v24 = vpop.f32.mrb[103].mxu0 }
 0x1d1   : > { %v2953_v38 = vadd.f32 %v2952_v24, %v2951_v58  ;;  %v4380_v26 = vadd.f32 %v2950_v14, %v4315_v22 }
 0x1d3   : > { %v4383_v3 = vadd.f32 %v2953_v38, %v4326_v44 }
 0x1d5   : > { %v2954_v62 = vpop.f32.mrb[104].mxu0 }
 0x1d6   : > { %v2955_v59 = vpop.f32.mrb[105].mxu0 }
 0x1d7   : > { %v2956_v7 = vadd.f32 %v2955_v59, %v2954_v62  ;;  %v2957_v15 = vpop.f32.mrb[106].mxu0 }
 0x1d8   : > { %v2958_v30 = vpop.f32.mrb[107].mxu0 }
 0x1d9   : > { %v2959_v33 = vadd.f32 %v2958_v30, %v2957_v15  ;;  %v4387_v50 = vadd.f32 %v2956_v7, %v4339_v5 }
 0x1db   : > { %v4389_v18 = vadd.f32 %v2959_v33, %v1366_v55  ;;  %v4401_v55 = vld [vmem:[%s4539_s3] ss:$0 sm:$0xff] }
 0x1dd   : > { %v2960_v22 = vpop.f32.mrb[108].mxu0 }
 0x1de   : > { %v2961_v20 = vpop.f32.mrb[109].mxu0 }
 0x1df   : > { %v2962_v29 = vadd.f32 %v2961_v20, %v2960_v22  ;;  %v2963_v44 = vpop.f32.mrb[110].mxu0 }
 0x1e0   : > { %v2964_v25 = vpop.f32.mrb[111].mxu0 }
 0x1e1   : > { %v2965_v49 = vadd.f32 %v2964_v25, %v2963_v44  ;;  %v4393_v53 = vadd.f32 %v2962_v29, %v4335_v57 }
 0x1e3   : > { %v4396_v43 = vadd.f32 %v2965_v49, %v4346_v11 }
 0x1e5   : > { %v2966_v5 = vpop.f32.mrb[112].mxu0  ;;  %v3152_v46 = vpop.f32.mrb[80].mxu1 }
 0x1e6   : > { %v3201_v39 = vadd.f32 %v3200_v19, %v3152_v46  ;;  %v2967_v12 = vpop.f32.mrb[113].mxu0  ;;  %v2034_v37 = vpop.f32.mrb[81].mxu1 }
 0x1e7   : > { %v2968_v0 = vadd.f32 %v2967_v12, %v2966_v5  ;;  %v3205_v54 = vadd.f32 %v4353_v23, %v2034_v37  ;;  %v2969_v57 = vpop.f32.mrb[114].mxu0  ;;  %v3153_v51 = vpop.f32.mrb[82].mxu1  ;;  %v4543_v37 = vld [vmem:[#allocation2_spill] sm:$0xff] }
 0x1e8   : > { %v2202_v28 = vadd.f32 %v3201_v39, %v4401_v55  ;;  %v3209_v11 = vadd.f32 %v4360_v27, %v3153_v51  ;;  %v2970_v36 = vpop.f32.mrb[115].mxu0  ;;  %v2037_v16 = vpop.f32.mrb[83].mxu1 }
 0x1e9   : > { %v2200_v19 = vadd.f32 %v3205_v54, %v4401_v55  ;;  %v2971_v21 = vadd.f32 %v2970_v36, %v2969_v57  ;;  %v3213_v23 = vadd.f32 %v4356_v9, %v2037_v16  ;;  %v4414_v8 = vadd.f32 %v4238_v13, %v2968_v0 }
 0x1ea   : > { %v2234_v27 = vmax.f32 %v2202_v28, 0.0  ;;  %v2203_v61 = vadd.f32 %v3209_v11, %v4401_v55 }
 0x1eb   : > { %v2232_v1 = vmax.f32 %v2200_v19, 0.0  ;;  %v2201_v14 = vadd.f32 %v3213_v23, %v4401_v55  ;;  %v4419_v58 = vadd.f32 %v4242_v41, %v2971_v21 }
 0x1ec   : > { %2266 = vst [vmem:[%s4409_s12 + $0x10] sm:$0xff] %v2234_v27  ;;  %v2235_v24 = vmax.f32 %v2203_v61, 0.0 }
 0x1ed   : > { %2264 = vst [vmem:[%s4409_s12] sm:$0xff] %v2232_v1  ;;  %v2233_v38 = vmax.f32 %v2201_v14, 0.0  ;;  %v2972_v62 = vpop.f32.mrb[116].mxu0  ;;  %v3156_v59 = vpop.f32.mrb[84].mxu1 }
 0x1ee   : > { %2267 = vst [vmem:[%s4409_s12 + $0x18] sm:$0xff] %v2235_v24  ;;  %v3217_v13 = vadd.f32 %v4369_v10, %v3156_v59  ;;  %v2973_v9 = vpop.f32.mrb[117].mxu0  ;;  %v2050_v7 = vpop.f32.mrb[85].mxu1 }
 0x1ef   : > { %2265 = vst [vmem:[%s4409_s12 + $0x8] sm:$0xff] %v2233_v38  ;;  %v2974_v15 = vadd.f32 %v2973_v9, %v2972_v62  ;;  %v3221_v30 = vadd.f32 %v4363_v40, %v2050_v7  ;;  %v2975_v33 = vpop.f32.mrb[118].mxu0  ;;  %v3157_v22 = vpop.f32.mrb[86].mxu1 }
 0x1f0   : > { %v2206_v41 = vadd.f32 %v3217_v13, %v4401_v55  ;;  %v3225_v20 = vadd.f32 %v4372_v56, %v3157_v22  ;;  %v2976_v29 = vpop.f32.mrb[119].mxu0  ;;  %v2053_v44 = vpop.f32.mrb[87].mxu1  ;;  %v4544_v13 = vld [vmem:[#allocation3_spill] sm:$0xff] }
 0x1f1   : > { %v2204_v25 = vadd.f32 %v3221_v30, %v4401_v55  ;;  %v2977_v10 = vadd.f32 %v2976_v29, %v2975_v33  ;;  %v3229_v49 = vadd.f32 %v4366_v31, %v2053_v44  ;;  %v4432_v5 = vadd.f32 %v4246_v63, %v2974_v15 }
 0x1f2   : > { %v2238_v40 = vmax.f32 %v2206_v41, 0.0  ;;  %v2207_v46 = vadd.f32 %v3225_v20, %v4401_v55 }
 0x1f3   : > { %v2236_v39 = vmax.f32 %v2204_v25, 0.0  ;;  %v2205_v12 = vadd.f32 %v3229_v49, %v4401_v55  ;;  %v4437_v56 = vadd.f32 %v4543_v37, %v2977_v10 }
 0x1f4   : > { %2270 = vst [vmem:[%s4409_s12 + $0x30] sm:$0xff] %v2238_v40  ;;  %v2239_v0 = vmax.f32 %v2207_v46, 0.0 }
 0x1f5   : > { %2268 = vst [vmem:[%s4409_s12 + $0x20] sm:$0xff] %v2236_v39  ;;  %v2237_v54 = vmax.f32 %v2205_v12, 0.0  ;;  %v2978_v57 = vpop.f32.mrb[120].mxu0  ;;  %v3160_v51 = vpop.f32.mrb[88].mxu1 }
 0x1f6   : > { %2271 = vst [vmem:[%s4409_s12 + $0x38] sm:$0xff] %v2239_v0  ;;  %v3233_v63 = vadd.f32 %v4380_v26, %v3160_v51  ;;  %v2979_v31 = vpop.f32.mrb[121].mxu0  ;;  %v2066_v28 = vpop.f32.mrb[89].mxu1 }
 0x1f7   : > { %2269 = vst [vmem:[%s4409_s12 + $0x28] sm:$0xff] %v2237_v54  ;;  %v2980_v11 = vadd.f32 %v2979_v31, %v2978_v57  ;;  %v3237_v36 = vadd.f32 %v4375_v42, %v2066_v28  ;;  %v2981_v16 = vpop.f32.mrb[122].mxu0  ;;  %v3161_v19 = vpop.f32.mrb[90].mxu1 }
 0x1f8   : > { %v2210_v21 = vadd.f32 %v3233_v63, %v4401_v55  ;;  %v3241_v23 = vadd.f32 %v4383_v3, %v3161_v19  ;;  %v2982_v27 = vpop.f32.mrb[123].mxu0  ;;  %v2069_v61 = vpop.f32.mrb[91].mxu1 }
 0x1f9   : > { %v2208_v1 = vadd.f32 %v3237_v36, %v4401_v55  ;;  %v2983_v26 = vadd.f32 %v2982_v27, %v2981_v16  ;;  %v3245_v14 = vadd.f32 %v4377_v32, %v2069_v61  ;;  %v4450_v24 = vadd.f32 %v4254_v60, %v2980_v11 }
 0x1fa   : > { %v2242_v42 = vmax.f32 %v2210_v21, 0.0  ;;  %v2211_v38 = vadd.f32 %v3241_v23, %v4401_v55 }
 0x1fb   : > { %v2240_v62 = vmax.f32 %v2208_v1, 0.0  ;;  %v2209_v59 = vadd.f32 %v3245_v14, %v4401_v55  ;;  %v4455_v3 = vadd.f32 %v4544_v13, %v2983_v26 }
 0x1fc   : > { %2274 = vst [vmem:[%s4409_s12 + $0x50] sm:$0xff] %v2242_v42  ;;  %v2243_v9 = vmax.f32 %v2211_v38, 0.0 }
 0x1fd   : > { %2272 = vst [vmem:[%s4409_s12 + $0x40] sm:$0xff] %v2240_v62  ;;  %v2241_v7 = vmax.f32 %v2209_v59, 0.0  ;;  %v2984_v15 = vpop.f32.mrb[124].mxu0  ;;  %v3164_v30 = vpop.f32.mrb[92].mxu1 }
 0x1fe   : > { %2275 = vst [vmem:[%s4409_s12 + $0x58] sm:$0xff] %v2243_v9  ;;  %v3249_v60 = vadd.f32 %v4393_v53, %v3164_v30  ;;  %v2985_v32 = vpop.f32.mrb[125].mxu0  ;;  %v2082_v33 = vpop.f32.mrb[93].mxu1 }
 0x1ff   : > { %2273 = vst [vmem:[%s4409_s12 + $0x48] sm:$0xff] %v2241_v7  ;;  %v2986_v22 = vadd.f32 %v2985_v32, %v2984_v15  ;;  %v3253_v41 = vadd.f32 %v4387_v50, %v2082_v33  ;;  %v2987_v20 = vpop.f32.mrb[126].mxu0  ;;  %v3165_v29 = vpop.f32.mrb[94].mxu1 }
 0x200   : > { %v2214_v44 = vadd.f32 %v3249_v60, %v4401_v55  ;;  %v3257_v25 = vadd.f32 %v4396_v43, %v3165_v29  ;;  %v2988_v10 = vpop.f32.mrb[127].mxu0  ;;  %v2085_v49 = vpop.f32.mrb[95].mxu1 }
 0x201   : > { %v2212_v40 = vadd.f32 %v3253_v41, %v4401_v55  ;;  %v2989_v53 = vadd.f32 %v2988_v10, %v2987_v20  ;;  %v3261_v46 = vadd.f32 %v4389_v18, %v2085_v49  ;;  %v3275_v39 = vadd.f32 %v4262_v34, %v2986_v22 }
 0x202   : > { %v2246_v50 = vmax.f32 %v2214_v44, 0.0  ;;  %v2215_v12 = vadd.f32 %v3257_v25, %v4401_v55 }
 0x203   : > { %v2244_v37 = vmax.f32 %v2212_v40, 0.0  ;;  %v2213_v0 = vadd.f32 %v3261_v46, %v4401_v55  ;;  %v3281_v54 = vadd.f32 %v4266_v17, %v2989_v53 }
 0x204   : > { %2278 = vst [vmem:[%s4409_s12 + $0x70] sm:$0xff] %v2246_v50  ;;  %v2247_v43 = vmax.f32 %v2215_v12, 0.0 }
 0x205   : > { %2276 = vst [vmem:[%s4409_s12 + $0x60] sm:$0xff] %v2244_v37  ;;  %v2245_v57 = vmax.f32 %v2213_v0, 0.0  ;;  %v2990_v51 = vpop.f32.mrb[128].mxu0  ;;  %v3168_v63 = vpop.f32.mrb[0].mxu1 }
 0x206   : > { %2279 = vst [vmem:[%s4409_s12 + $0x78] sm:$0xff] %v2247_v43  ;;  %v3264_v18 = vadd.f32 %v4432_v5, %v3168_v63  ;;  %v2991_v31 = vpop.f32.mrb[129].mxu0  ;;  %v2098_v34 = vpop.f32.mrb[1].mxu1 }
 0x207   : > { %2277 = vst [vmem:[%s4409_s12 + $0x68] sm:$0xff] %v2245_v57  ;;  %v2992_v28 = vadd.f32 %v2991_v31, %v2990_v51  ;;  %v3267_v11 = vadd.f32 %v4414_v8, %v2098_v34  ;;  %v2993_v36 = vpop.f32.mrb[130].mxu0  ;;  %v3169_v16 = vpop.f32.mrb[2].mxu1 }
 0x208   : > { %v2218_v17 = vadd.f32 %v3264_v18, %v4401_v55  ;;  %v3270_v19 = vadd.f32 %v4437_v56, %v3169_v16  ;;  %v2994_v21 = vpop.f32.mrb[131].mxu0  ;;  %v2101_v23 = vpop.f32.mrb[3].mxu1 }
 0x209   : > { %v2216_v27 = vadd.f32 %v3267_v11, %v4401_v55  ;;  %v2995_v5 = vadd.f32 %v2994_v21, %v2993_v36  ;;  %v3273_v61 = vadd.f32 %v4419_v58, %v2101_v23  ;;  %v3290_v1 = vadd.f32 %v4278_v48, %v2992_v28 }
 0x20a   : > { %v2250_v8 = vmax.f32 %v2218_v17, 0.0  ;;  %v2219_v26 = vadd.f32 %v3270_v19, %v4401_v55 }
 0x20b   : > { %v2248_v14 = vmax.f32 %v2216_v27, 0.0  ;;  %v2217_v42 = vadd.f32 %v3273_v61, %v4401_v55  ;;  %v3296_v38 = vadd.f32 %v4288_v2, %v2995_v5 }
 0x20c   : > { %2282 = vst [vmem:[%s4409_s12 + $0x90] sm:$0xff] %v2250_v8  ;;  %v2251_v56 = vmax.f32 %v2219_v26, 0.0 }
 0x20d   : > { %2280 = vst [vmem:[%s4409_s12 + $0x80] sm:$0xff] %v2248_v14  ;;  %v2249_v62 = vmax.f32 %v2217_v42, 0.0  ;;  %v2996_v59 = vpop.f32.mrb[132].mxu0  ;;  %v3172_v13 = vpop.f32.mrb[4].mxu1 }
 0x20e   : > { %2283 = vst [vmem:[%s4409_s12 + $0x98] sm:$0xff] %v2251_v56  ;;  %v3276_v9 = vadd.f32 %v3275_v39, %v3172_v13  ;;  %v2997_v58 = vpop.f32.mrb[133].mxu0  ;;  %v2114_v7 = vpop.f32.mrb[5].mxu1 }
 0x20f   : > { %2281 = vst [vmem:[%s4409_s12 + $0x88] sm:$0xff] %v2249_v62  ;;  %v2998_v48 = vadd.f32 %v2997_v58, %v2996_v59  ;;  %v3279_v15 = vadd.f32 %v4450_v24, %v2114_v7  ;;  %v2999_v30 = vpop.f32.mrb[134].mxu0  ;;  %v3173_v60 = vpop.f32.mrb[6].mxu1 }
 0x210   : > { %v2222_v2 = vadd.f32 %v3276_v9, %v4401_v55  ;;  %v3282_v32 = vadd.f32 %v3281_v54, %v3173_v60  ;;  %v3000_v33 = vpop.f32.mrb[135].mxu0  ;;  %v2117_v22 = vpop.f32.mrb[7].mxu1 }
 0x211   : > { %v2220_v41 = vadd.f32 %v3279_v15, %v4401_v55  ;;  %v3001_v20 = vadd.f32 %v3000_v33, %v2999_v30  ;;  %v3285_v29 = vadd.f32 %v4455_v3, %v2117_v22  ;;  %v3287_v44 = vadd.f32 %v4300_v4, %v2998_v48 }
 0x212   : > { %v2254_v25 = vmax.f32 %v2222_v2, 0.0  ;;  %v2223_v24 = vadd.f32 %v3282_v32, %v4401_v55 }
 0x213   : > { %v2252_v10 = vmax.f32 %v2220_v41, 0.0  ;;  %v2221_v49 = vadd.f32 %v3285_v29, %v4401_v55  ;;  %v3293_v40 = vadd.f32 %v4310_v45, %v3001_v20 }
 0x214   : > { %2286 = vst [vmem:[%s4409_s12 + $0xb0] sm:$0xff] %v2254_v25  ;;  %v2255_v53 = vmax.f32 %v2223_v24, 0.0 }
 0x215   : > { %2284 = vst [vmem:[%s4409_s12 + $0xa0] sm:$0xff] %v2252_v10  ;;  %v2253_v46 = vmax.f32 %v2221_v49, 0.0  ;;  %v3002_v39 = vpop.f32.mrb[136].mxu0  ;;  %v3176_v50 = vpop.f32.mrb[8].mxu1 }
 0x216   : > { %2287 = vst [vmem:[%s4409_s12 + $0xb8] sm:$0xff] %v2255_v53  ;;  %v3288_v12 = vadd.f32 %v3287_v44, %v3176_v50  ;;  %v3003_v3 = vpop.f32.mrb[137].mxu0  ;;  %v2130_v37 = vpop.f32.mrb[9].mxu1 }
 0x217   : > { %2285 = vst [vmem:[%s4409_s12 + $0xa8] sm:$0xff] %v2253_v46  ;;  %v3004_v4 = vadd.f32 %v3003_v3, %v3002_v39  ;;  %v3291_v0 = vadd.f32 %v3290_v1, %v2130_v37  ;;  %v3005_v54 = vpop.f32.mrb[138].mxu0  ;;  %v3177_v43 = vpop.f32.mrb[10].mxu1 }
 0x218   : > { %v2226_v57 = vadd.f32 %v3288_v12, %v4401_v55  ;;  %v3294_v45 = vadd.f32 %v3293_v40, %v3177_v43  ;;  %v3006_v51 = vpop.f32.mrb[139].mxu0  ;;  %v2133_v63 = vpop.f32.mrb[11].mxu1 }
 0x219   : > { %v2224_v18 = vadd.f32 %v3291_v0, %v4401_v55  ;;  %v3007_v31 = vadd.f32 %v3006_v51, %v3005_v54  ;;  %v3297_v34 = vadd.f32 %v3296_v38, %v2133_v63  ;;  %v3302_v28 = vadd.f32 %v4322_v47, %v3004_v4 }
 0x21a   : > { %v2258_v11 = vmax.f32 %v2226_v57, 0.0  ;;  %v2227_v36 = vadd.f32 %v3294_v45, %v4401_v55 }
 0x21b   : > { %v2256_v16 = vmax.f32 %v2224_v18, 0.0  ;;  %v2225_v17 = vadd.f32 %v3297_v34, %v4401_v55  ;;  %v3308_v19 = vadd.f32 %v4330_v52, %v3007_v31 }
 0x21c   : > { %2290 = vst [vmem:[%s4409_s12 + $0xd0] sm:$0xff] %v2258_v11  ;;  %v2259_v21 = vmax.f32 %v2227_v36, 0.0 }
 0x21d   : > { %2288 = vst [vmem:[%s4409_s12 + $0xc0] sm:$0xff] %v2256_v16  ;;  %v2257_v23 = vmax.f32 %v2225_v17, 0.0  ;;  %v3008_v27 = vpop.f32.mrb[140].mxu0  ;;  %v3180_v5 = vpop.f32.mrb[12].mxu1 }
 0x21e   : > { %2291 = vst [vmem:[%s4409_s12 + $0xd8] sm:$0xff] %v2259_v21  ;;  %v3009_v61 = vpop.f32.mrb[141].mxu0  ;;  %v2146_v1 = vpop.f32.mrb[13].mxu1 }
 0x21f   : > { %2289 = vst [vmem:[%s4409_s12 + $0xc8] sm:$0xff] %v2257_v23  ;;  %v3010_v47 = vadd.f32 %v3009_v61, %v3008_v27  ;;  %v3303_v8 = vadd.f32 %v3302_v28, %v2146_v1  ;;  %v3011_v26 = vpop.f32.mrb[142].mxu0  ;;  %v3181_v14 = vpop.f32.mrb[14].mxu1 }
 0x220   : > { %v3012_v42 = vpop.f32.mrb[143].mxu0  ;;  %v2149_v38 = vpop.f32.mrb[15].mxu1 }
 0x221   : > { %v3299_v52 = vadd.f32 %v4342_v35, %v3010_v47  ;;  %v2228_v56 = vadd.f32 %v3303_v8, %v4401_v55  ;;  %v3013_v62 = vadd.f32 %v3012_v42, %v3011_v26  ;;  %v3309_v59 = vadd.f32 %v3308_v19, %v2149_v38 }
 0x223   : > { %v3300_v13 = vadd.f32 %v3299_v52, %v3180_v5  ;;  %v2260_v9 = vmax.f32 %v2228_v56, 0.0  ;;  %v3305_v58 = vadd.f32 %v4350_v6, %v3013_v62  ;;  %v2229_v7 = vadd.f32 %v3309_v59, %v4401_v55 }
 0x225   : > { %v2230_v48 = vadd.f32 %v3300_v13, %v4401_v55  ;;  %2292 = vst [vmem:[%s4409_s12 + $0xe0] sm:$0xff] %v2260_v9  ;;  %v3306_v15 = vadd.f32 %v3305_v58, %v3181_v14  ;;  %v2261_v30 = vmax.f32 %v2229_v7, 0.0 }
 0x227   : > { %v2262_v60 = vmax.f32 %v2230_v48, 0.0  ;;  %v2231_v2 = vadd.f32 %v3306_v15, %v4401_v55  ;;  %2293 = vst [vmem:[%s4409_s12 + $0xe8] sm:$0xff] %v2261_v30 }
 0x229   : > { %2294 = vst [vmem:[%s4409_s12 + $0xf0] sm:$0xff] %v2262_v60  ;;  %v2263_v35 = vmax.f32 %v2231_v2, 0.0 }
 0x22b   : > { %2295 = vst [vmem:[%s4409_s12 + $0xf8] sm:$0xff] %v2263_v35 }
 0x22c PF: > { %s14_s19 = sadd.s32 1, %s3529_s19   ;;  %s4545_s15 = smov %s3521_s17 }
 0x22d   : > { %p11_p9 = scmp.ge.s32.totalorder %s14_s19, 10   ;;  %s4546_s16 = smov %s3525_s18 }
 0x22e   : > { %s4547_s17 = smov %s4550_s20  ;;  %s4548_s18 = smov %s4554_s21 }
 0x22f   :  { %13 = sbr.rel (!%p11_p9) target bundleno = 3 (0x3), region = 71 }

</bundles_post_ra>
